<compile_context>
chip_gen: v7x
topology: tpu7x:2x2x1
jax: 0.10.0
libtpu: 0.0.40
codegen_flags: <defaults>
</compile_context>

<pallas_src>
import functools
import math

import jax
import jax.numpy as jnp
from jax.experimental import pallas as pl
from jax.experimental.pallas import tpu as pltpu

_NEG_INF = -1e30          # finite "masked" sentinel (avoids exp(-inf - -inf) NaNs)
_VMEM_LIMIT = 32 * 1024 * 1024   # safe on v5e/v6e (128 MiB phys) and v7x (64 MiB phys)


def _cparams(semantics):
    return pltpu.CompilerParams(dimension_semantics=semantics,
                                vmem_limit_bytes=_VMEM_LIMIT)


def _pick_tile(dim, pref, align):
    """Largest tile <= pref that divides dim and is `align`-aligned, else full dim.

    A block equal to the full dim is always legal (the (8,128) divisibility
    rule only applies to partial blocks)."""
    if dim <= pref:
        return dim
    t = (pref // align) * align
    while t >= align:
        if dim % t == 0:
            return t
        t -= align
    return dim


# ----------------------------- Pallas kernels -----------------------------

def _matmul_kernel(x_ref, w_ref, o_ref, acc_ref):
    """Tiled y = x @ w (w pre-transposed), f32 accumulation over the K grid axis."""
    @pl.when(pl.program_id(2) == 0)
    def _init():
        acc_ref[...] = jnp.zeros_like(acc_ref)

    acc_ref[...] += jnp.dot(x_ref[...], w_ref[...],
                            preferred_element_type=jnp.float32)

    @pl.when(pl.program_id(2) == pl.num_programs(2) - 1)
    def _done():
        o_ref[...] = acc_ref[...]


def linear(x, w_t, *, tm=256, tn=256, tk=512):
    """y = x @ w_t  (w_t already stored as (K, N); PyTorch Linear bias=False)."""
    *lead, K = x.shape
    N = w_t.shape[1]
    x2 = x.reshape(-1, K)
    M = x2.shape[0]
    btm = _pick_tile(M, tm, 8)
    btn = _pick_tile(N, tn, 128)
    btk = _pick_tile(K, tk, 128)
    out = pl.pallas_call(
        _matmul_kernel,
        grid=(M // btm, N // btn, K // btk),
        in_specs=[pl.BlockSpec((btm, btk), lambda i, j, k: (i, k)),
                  pl.BlockSpec((btk, btn), lambda i, j, k: (k, j))],
        out_specs=pl.BlockSpec((btm, btn), lambda i, j, k: (i, j)),
        out_shape=jax.ShapeDtypeStruct((M, N), jnp.float32),
        scratch_shapes=[pltpu.VMEM((btm, btn), jnp.float32)],
        compiler_params=_cparams(("parallel", "parallel", "arbitrary")),
    )(x2, w_t)
    return out.reshape(*lead, N)


def _attention_kernel(q_ref, k_ref, v_ref, m_ref, o_ref, *, scale):
    """All heads of one batch element per grid step (lane/sublane dense blocks)."""
    q = q_ref[0]                 # (nh, Sq, dk)
    k = k_ref[0]                 # (nh, Sk, dk)
    v = v_ref[0]                 # (nh, Sk, dk)
    m = m_ref[...]               # (1, Sq, Sk); 1.0 == masked out

    s = jnp.einsum('hqd,hkd->hqk', q, k, preferred_element_type=jnp.float32)
    s = jnp.where(m > 0.0, _NEG_INF, s)      # masked_fill_(mask, -inf) (finite-safe)
    s = s * scale                            # softmax(w / sqrt(dk))
    s_max = jnp.max(s, axis=-1, keepdims=True)
    p = jnp.exp(s - s_max)
    denom = jnp.sum(p, axis=-1, keepdims=True)
    p = p * pl.reciprocal(denom, approx=True)
    o_ref[0] = jnp.einsum('hqk,hkd->hqd', p, v,
                          preferred_element_type=jnp.float32)


def attention(qh, kh, vh, mask, dk):
    """qh/kh/vh: (B, n_heads, S, dk); mask: (B, Sq, Sk) float (1.0 = masked)."""
    B, nh, Sq, _ = qh.shape
    Sk = kh.shape[2]
    scale = 1.0 / math.sqrt(dk)
    return pl.pallas_call(
        functools.partial(_attention_kernel, scale=scale),
        grid=(B,),
        in_specs=[pl.BlockSpec((1, nh, Sq, dk), lambda b: (b, 0, 0, 0)),
                  pl.BlockSpec((1, nh, Sk, dk), lambda b: (b, 0, 0, 0)),
                  pl.BlockSpec((1, nh, Sk, dk), lambda b: (b, 0, 0, 0)),
                  pl.BlockSpec((1, Sq, Sk), lambda b: (b, 0, 0))],
        out_specs=pl.BlockSpec((1, nh, Sq, dk), lambda b: (b, 0, 0, 0)),
        out_shape=jax.ShapeDtypeStruct((B, nh, Sq, dk), jnp.float32),
        compiler_params=_cparams(("parallel",)),
    )(qh, kh, vh, mask)


def _add_ln_kernel(x_ref, y_ref, g_ref, b_ref, o_ref, *, eps):
    s = x_ref[...] + y_ref[...]                       # fused residual add
    mean = jnp.mean(s, axis=-1, keepdims=True)
    c = s - mean
    var = jnp.mean(c * c, axis=-1, keepdims=True)     # biased, like nn.LayerNorm
    o_ref[...] = c * jax.lax.rsqrt(var + eps) * g_ref[...] + b_ref[...]


def add_layernorm(x, y, gamma, beta, eps=1e-5, tm=512):
    """LayerNorm(x + y) fused in one kernel, M-tiled."""
    *lead, H = x.shape
    x2 = x.reshape(-1, H)
    y2 = y.reshape(-1, H)
    M = x2.shape[0]
    btm = _pick_tile(M, tm, 8)
    out = pl.pallas_call(
        functools.partial(_add_ln_kernel, eps=eps),
        grid=(M // btm,),
        in_specs=[pl.BlockSpec((btm, H), lambda i: (i, 0)),
                  pl.BlockSpec((btm, H), lambda i: (i, 0)),
                  pl.BlockSpec((1, H), lambda i: (0, 0)),
                  pl.BlockSpec((1, H), lambda i: (0, 0))],
        out_specs=pl.BlockSpec((btm, H), lambda i: (i, 0)),
        out_shape=jax.ShapeDtypeStruct((M, H), jnp.float32),
        compiler_params=_cparams(("parallel",)),
    )(x2, y2, gamma.reshape(1, H), beta.reshape(1, H))
    return out.reshape(*lead, H)


def _ffn_kernel(x_ref, w1_ref, b1_ref, w2_ref, b2_ref, o_ref):
    h = jnp.dot(x_ref[...], w1_ref[...], preferred_element_type=jnp.float32)
    h = jnp.maximum(h + b1_ref[...], 0.0)             # bias + ReLU in VMEM
    o_ref[...] = jnp.dot(h, w2_ref[...],
                         preferred_element_type=jnp.float32) + b2_ref[...]


def ffn(z, w1_t, b1, w2_t, b2, tm=256):
    """Fused Linear(H->4H) + ReLU + Linear(4H->H); 4H intermediate never hits HBM."""
    # TODO(synk): for large H the full (H,4H)/(4H,H) weight blocks should be
    # K/N-tiled with an accumulator; fine at toy/medium sizes (weights resident).
    *lead, H = z.shape
    Hf = w1_t.shape[1]
    z2 = z.reshape(-1, H)
    M = z2.shape[0]
    btm = _pick_tile(M, tm, 8)
    out = pl.pallas_call(
        _ffn_kernel,
        grid=(M // btm,),
        in_specs=[pl.BlockSpec((btm, H), lambda i: (i, 0)),
                  pl.BlockSpec((H, Hf), lambda i: (0, 0)),
                  pl.BlockSpec((1, Hf), lambda i: (0, 0)),
                  pl.BlockSpec((Hf, H), lambda i: (0, 0)),
                  pl.BlockSpec((1, H), lambda i: (0, 0))],
        out_specs=pl.BlockSpec((btm, H), lambda i: (i, 0)),
        out_shape=jax.ShapeDtypeStruct((M, H), jnp.float32),
        compiler_params=_cparams(("parallel",)),
    )(z2, w1_t, b1.reshape(1, Hf), w2_t, b2.reshape(1, H))
    return out.reshape(*lead, H)


def _generator_kernel(x_ref, w_ref, b_ref, o_ref):
    logits = jnp.dot(x_ref[...], w_ref[...],
                     preferred_element_type=jnp.float32) + b_ref[...]
    m = jnp.max(logits, axis=-1, keepdims=True)
    z = logits - m
    lse = jnp.log(jnp.sum(jnp.exp(z), axis=-1, keepdims=True))
    o_ref[...] = z - lse                      # Linear + LogSoftmax(dim=-1)


def generator(x, w_t, b, tm=256):
    # TODO(synk): for a real vocabulary, tile the vocab axis with an online
    # log-sum-exp accumulator instead of one (tm, V) block.
    *lead, K = x.shape
    V = w_t.shape[1]
    x2 = x.reshape(-1, K)
    M = x2.shape[0]
    btm = _pick_tile(M, tm, 8)
    out = pl.pallas_call(
        _generator_kernel,
        grid=(M // btm,),
        in_specs=[pl.BlockSpec((btm, K), lambda i: (i, 0)),
                  pl.BlockSpec((K, V), lambda i: (0, 0)),
                  pl.BlockSpec((1, V), lambda i: (0, 0))],
        out_specs=pl.BlockSpec((btm, V), lambda i: (i, 0)),
        out_shape=jax.ShapeDtypeStruct((M, V), jnp.float32),
        compiler_params=_cparams(("parallel",)),
    )(x2, w_t, b.reshape(1, V))
    return out.reshape(*lead, V)


# ----------------------------- model composition -----------------------------

def _split_heads(t, n_splits):
    B, S, H = t.shape
    dk = H // n_splits
    return t.reshape(B, S, n_splits, dk).transpose(0, 2, 1, 3)   # (B, nh, S, dk)


def _merge_heads(t):
    B, nh, S, dk = t.shape
    return t.transpose(0, 2, 1, 3).reshape(B, S, nh * dk)


def multi_head_self(x, mask, p, n_splits):
    """Fused QKV projection; mask is (B, Sq, Sk) float, shared across heads."""
    H = x.shape[-1]
    dk = H // n_splits
    qkv = linear(x, p["w_qkv"])                    # one (H, 3H) matmul, x read once
    q, k, v = jnp.split(qkv, 3, axis=-1)
    c = attention(_split_heads(q, n_splits), _split_heads(k, n_splits),
                  _split_heads(v, n_splits), mask, dk)
    return linear(_merge_heads(c), p["w_o"])


def multi_head_cross(q_in, kv_in, mask, p, n_splits):
    H = q_in.shape[-1]
    dk = H // n_splits
    q = linear(q_in, p["w_q"])
    kv = linear(kv_in, p["w_kv"])                  # fused K|V (H, 2H) matmul
    k, v = jnp.split(kv, 2, axis=-1)
    c = attention(_split_heads(q, n_splits), _split_heads(k, n_splits),
                  _split_heads(v, n_splits), mask, dk)
    return linear(_merge_heads(c), p["w_o"])


def encoder_block(x, mask, p, n_splits):
    a = multi_head_self(x, mask, p["attn"], n_splits)
    z = add_layernorm(x, a, p["attn_norm_g"], p["attn_norm_b"])
    f = ffn(z, p["fc_w1"], p["fc_b1"], p["fc_w2"], p["fc_b2"])
    return add_layernorm(z, f, p["fc_norm_g"], p["fc_norm_b"])


def decoder_block(h, z_enc, mask_dec, future_mask, p, n_splits):
    a = multi_head_self(h, future_mask, p["masked_attn"], n_splits)
    hh = add_layernorm(h, a, p["masked_attn_norm_g"], p["masked_attn_norm_b"])
    a2 = multi_head_cross(hh, z_enc, mask_dec, p["attn"], n_splits)
    hh = add_layernorm(hh, a2, p["attn_norm_g"], p["attn_norm_b"])
    f = ffn(hh, p["fc_w1"], p["fc_b1"], p["fc_w2"], p["fc_b2"])
    return add_layernorm(hh, f, p["fc_norm_g"], p["fc_norm_b"])


def make_pos_enc(hidden, max_length):
    pos = jnp.arange(max_length, dtype=jnp.float32)[:, None]
    dim = jnp.arange(hidden // 2, dtype=jnp.float32)[None, :]
    angle = pos / jnp.power(10000.0, dim / float(hidden))
    enc = jnp.zeros((max_length, hidden), jnp.float32)
    enc = enc.at[:, 0::2].set(jnp.sin(angle))
    enc = enc.at[:, 1::2].set(jnp.cos(angle))
    return enc


def transformer_forward(params, x, y, attention_mask_src, *, n_splits):
    B, Sx = x.shape
    Sy = y.shape[1]
    pad = jnp.logical_not(attention_mask_src.astype(bool))            # True = pad
    mask_enc = jnp.broadcast_to(pad[:, None, :], (B, Sx, Sx)).astype(jnp.float32)
    mask_dec = jnp.broadcast_to(pad[:, None, :], (B, Sy, Sx)).astype(jnp.float32)
    future = jnp.triu(jnp.ones((Sy, Sy), jnp.float32), k=1)
    future_mask = jnp.broadcast_to(future[None], (B, Sy, Sy))
    pos_enc = params["pos_enc"]

    # Embedding gather + positional add stay in XLA; emb_dropout is identity (eval).
    z = params["emb_enc"][x] + pos_enc[None, :Sx, :]
    for p in params["encoder"]:
        z = encoder_block(z, mask_enc, p, n_splits)

    h = params["emb_dec"][y] + pos_enc[None, :Sy, :]
    for p in params["decoder"]:
        h = decoder_block(h, z, mask_dec, future_mask, p, n_splits)

    return generator(h, params["gen_w"], params["gen_b"])


# ----------------------------- parameter init -----------------------------
# All dense weights are stored PRE-TRANSPOSED as (in_features, out_features)
# so kernels consume them directly (no per-call transpose).  Q/K/V are fused.

class _KeyGen:
    def __init__(self, key):
        self._key = key

    def __call__(self):
        self._key, k = jax.random.split(self._key)
        return k


def _nrm(kg, shape, scale=0.05):
    return scale * jax.random.normal(kg(), shape, jnp.float32)


def _self_mha_params(kg, H):
    return {"w_qkv": _nrm(kg, (H, 3 * H)), "w_o": _nrm(kg, (H, H))}


def _cross_mha_params(kg, H):
    return {"w_q": _nrm(kg, (H, H)), "w_kv": _nrm(kg, (H, 2 * H)),
            "w_o": _nrm(kg, (H, H))}


def _ffn_and_norms(kg, H):
    return {
        "fc_w1": _nrm(kg, (H, 4 * H)), "fc_b1": _nrm(kg, (4 * H,)),
        "fc_w2": _nrm(kg, (4 * H, H)), "fc_b2": _nrm(kg, (H,)),
        "attn_norm_g": jnp.ones((H,), jnp.float32),
        "attn_norm_b": jnp.zeros((H,), jnp.float32),
        "fc_norm_g": jnp.ones((H,), jnp.float32),
        "fc_norm_b": jnp.zeros((H,), jnp.float32),
    }


def init_params(key, input_size, hidden, output_size, n_enc, n_dec, max_length):
    kg = _KeyGen(key)
    params = {
        "emb_enc": _nrm(kg, (input_size, hidden), 0.1),
        "emb_dec": _nrm(kg, (output_size, hidden), 0.1),
        "pos_enc": make_pos_enc(hidden, max_length),
        "gen_w": _nrm(kg, (hidden, output_size)),     # pre-transposed (H, V)
        "gen_b": _nrm(kg, (output_size,)),
        "encoder": [],
        "decoder": [],
    }
    for _ in range(n_enc):
        blk = {"attn": _self_mha_params(kg, hidden)}
        blk.update(_ffn_and_norms(kg, hidden))
        params["encoder"].append(blk)
    for _ in range(n_dec):
        blk = {"masked_attn": _self_mha_params(kg, hidden),
               "attn": _cross_mha_params(kg, hidden),
               "masked_attn_norm_g": jnp.ones((hidden,), jnp.float32),
               "masked_attn_norm_b": jnp.zeros((hidden,), jnp.float32)}
        blk.update(_ffn_and_norms(kg, hidden))
        params["decoder"].append(blk)
    return params


# ----------------------------- main -----------------------------

if __name__ == "__main__":
    input_size, output_size = 13, 17
    hidden_size, n_splits = 32, 4
    n_enc_blocks = n_dec_blocks = 2        # module builds both with n_enc_blocks
    max_length = 256
    B, Sx, Sy = 2, 8, 8

    key = jax.random.PRNGKey(0)
    kp, kx, ky = jax.random.split(key, 3)

    params = init_params(kp, input_size, hidden_size, output_size,
                         n_enc_blocks, n_dec_blocks, max_length)

    x = jax.random.randint(kx, (B, Sx), 0, input_size, dtype=jnp.int32)
    y = jax.random.randint(ky, (B, Sy), 0, output_size, dtype=jnp.int32)
    lengths = jnp.array([Sx, 5], dtype=jnp.int32)
    # HF-style mask: 1 = valid token, 0 = padding (forward() flips it).
    attention_mask_src = (jnp.arange(Sx)[None, :] < lengths[:, None]).astype(jnp.int32)

    fwd = jax.jit(functools.partial(transformer_forward, n_splits=n_splits))
    y_hat = fwd(params, x, y, attention_mask_src)
    y_hat = jax.block_until_ready(y_hat)

    assert y_hat.shape == (B, Sy, output_size), y_hat.shape
    assert bool(jnp.all(jnp.isfinite(y_hat)))
    # log-softmax rows must sum to 1 in prob space
    assert bool(jnp.allclose(jnp.sum(jnp.exp(y_hat), axis=-1), 1.0, atol=1e-4))
    print("KERNEL_OK")
</pallas_src>

<mosaic_0001>
module attributes {stable_mosaic.version = 11 : i64} {
  func.func @_matmul_kernel(%arg0: i32, %arg1: i32, %arg2: i32, %arg3: memref<16x32xf32, #tpu.memory_space<vmem>>, %arg4: memref<32x96xf32, #tpu.memory_space<vmem>>, %arg5: memref<16x96xf32, #tpu.memory_space<vmem>>, %arg6: memref<16x96xf32, #tpu.memory_space<vmem>>) attributes {dimension_semantics = [#tpu.dimension_semantics<parallel>, #tpu.dimension_semantics<parallel>, #tpu.dimension_semantics<arbitrary>], iteration_bounds = array<i64: 1, 1, 1>, scalar_prefetch = 0 : i64, scratch_operands = 1 : i64, tpu.core_type = #tpu.core_type<tc>, window_params = [{transform_indices = @transform_0, window_bounds = array<i64: 16, 32>}, {transform_indices = @transform_1, window_bounds = array<i64: 32, 96>}, {transform_indices = @transform_2, window_bounds = array<i64: 16, 96>}]} {
    %c0_i32 = arith.constant 0 : i32
    %0 = arith.cmpi eq, %arg2, %c0_i32 : i32
    %1 = arith.extui %0 : i1 to i32
    %c0_i32_0 = arith.constant 0 : i32
    %2 = arith.cmpi ne, %1, %c0_i32_0 : i32
    scf.if %2 {
      %cst_10 = arith.constant 0.000000e+00 : f32
      %12 = vector.broadcast %cst_10 : f32 to vector<16x96xf32>
      %c0_11 = arith.constant 0 : index
      %c0_12 = arith.constant 0 : index
      %13 = vector.load %arg6[%c0_11, %c0_12] : memref<16x96xf32, #tpu.memory_space<vmem>>, vector<16x96xf32>
      tpu.vector_store %arg6[%c0_11, %c0_12], %12 {strides = array<i32>} : memref<16x96xf32, #tpu.memory_space<vmem>>, vector<16x96xf32>,
    } else {
    }
    %c0 = arith.constant 0 : index
    %c0_1 = arith.constant 0 : index
    %3 = vector.load %arg6[%c0, %c0_1] : memref<16x96xf32, #tpu.memory_space<vmem>>, vector<16x96xf32>
    %c0_2 = arith.constant 0 : index
    %c0_3 = arith.constant 0 : index
    %4 = vector.load %arg3[%c0_2, %c0_3] : memref<16x32xf32, #tpu.memory_space<vmem>>, vector<16x32xf32>
    %c0_4 = arith.constant 0 : index
    %c0_5 = arith.constant 0 : index
    %5 = vector.load %arg4[%c0_4, %c0_5] : memref<32x96xf32, #tpu.memory_space<vmem>>, vector<32x96xf32>
    %cst = arith.constant dense<0.000000e+00> : vector<16x96xf32>
    %6 = tpu.matmul %4, %5, %cst {dimension_numbers = #tpu.dot_dimension_numbers<[1], [0], [0], [1], [0, 0, 1, 1], [], []>} : vector<16x32xf32>, vector<32x96xf32>, vector<16x96xf32> -> vector<16x96xf32>
    %7 = arith.addf %3, %6 : vector<16x96xf32>
    %c0_6 = arith.constant 0 : index
    %c0_7 = arith.constant 0 : index
    %8 = vector.load %arg6[%c0_6, %c0_7] : memref<16x96xf32, #tpu.memory_space<vmem>>, vector<16x96xf32>
    tpu.vector_store %arg6[%c0_6, %c0_7], %7 {strides = array<i32>} : memref<16x96xf32, #tpu.memory_space<vmem>>, vector<16x96xf32>,
    %c0_i32_8 = arith.constant 0 : i32
    %9 = arith.cmpi eq, %arg2, %c0_i32_8 : i32
    %10 = arith.extui %9 : i1 to i32
    %c0_i32_9 = arith.constant 0 : i32
    %11 = arith.cmpi ne, %10, %c0_i32_9 : i32
    scf.if %11 {
      %c0_10 = arith.constant 0 : index
      %c0_11 = arith.constant 0 : index
      %12 = vector.load %arg6[%c0_10, %c0_11] : memref<16x96xf32, #tpu.memory_space<vmem>>, vector<16x96xf32>
      %c0_12 = arith.constant 0 : index
      %c0_13 = arith.constant 0 : index
      %13 = vector.load %arg5[%c0_12, %c0_13] : memref<16x96xf32, #tpu.memory_space<vmem>>, vector<16x96xf32>
      tpu.vector_store %arg5[%c0_12, %c0_13], %12 {strides = array<i32>} : memref<16x96xf32, #tpu.memory_space<vmem>>, vector<16x96xf32>,
    } else {
    }
    return
  }
  func.func @transform_0(%arg0: i32, %arg1: i32, %arg2: i32) -> (i32, i32) {
    %c0_i32 = arith.constant 0 : i32
    return %arg0, %arg2 : i32, i32
  }
  func.func @transform_1(%arg0: i32, %arg1: i32, %arg2: i32) -> (i32, i32) {
    %c0_i32 = arith.constant 0 : i32
    return %arg2, %arg1 : i32, i32
  }
  func.func @transform_2(%arg0: i32, %arg1: i32, %arg2: i32) -> (i32, i32) {
    %c0_i32 = arith.constant 0 : i32
    return %arg0, %arg1 : i32, i32
  }
}

module attributes {stable_mosaic.version = 11 : i64} {
  func.func @_attention_kernel(%arg0: i32, %arg1: memref<1x4x8x8xf32, #tpu.memory_space<vmem>>, %arg2: memref<1x4x8x8xf32, #tpu.memory_space<vmem>>, %arg3: memref<1x4x8x8xf32, #tpu.memory_space<vmem>>, %arg4: memref<1x8x8xf32, #tpu.memory_space<vmem>>, %arg5: memref<1x4x8x8xf32, #tpu.memory_space<vmem>>) attributes {dimension_semantics = [#tpu.dimension_semantics<parallel>], iteration_bounds = array<i64: 2>, scalar_prefetch = 0 : i64, scratch_operands = 0 : i64, tpu.core_type = #tpu.core_type<tc>, window_params = [{transform_indices = @transform_0, window_bounds = array<i64: 1, 4, 8, 8>}, {transform_indices = @transform_1, window_bounds = array<i64: 1, 4, 8, 8>}, {transform_indices = @transform_2, window_bounds = array<i64: 1, 4, 8, 8>}, {transform_indices = @transform_3, window_bounds = array<i64: 1, 8, 8>}, {transform_indices = @transform_4, window_bounds = array<i64: 1, 4, 8, 8>}]} {
    %c0 = arith.constant 0 : index
    %c0_0 = arith.constant 0 : index
    %c0_1 = arith.constant 0 : index
    %c0_2 = arith.constant 0 : index
    %0 = vector.load %arg1[%c0, %c0_0, %c0_1, %c0_2] : memref<1x4x8x8xf32, #tpu.memory_space<vmem>>, vector<1x4x8x8xf32>
    %1 = vector.shape_cast %0 : vector<1x4x8x8xf32> to vector<4x8x8xf32>
    %c0_3 = arith.constant 0 : index
    %c0_4 = arith.constant 0 : index
    %c0_5 = arith.constant 0 : index
    %c0_6 = arith.constant 0 : index
    %2 = vector.load %arg2[%c0_3, %c0_4, %c0_5, %c0_6] : memref<1x4x8x8xf32, #tpu.memory_space<vmem>>, vector<1x4x8x8xf32>
    %3 = vector.shape_cast %2 : vector<1x4x8x8xf32> to vector<4x8x8xf32>
    %c0_7 = arith.constant 0 : index
    %c0_8 = arith.constant 0 : index
    %c0_9 = arith.constant 0 : index
    %c0_10 = arith.constant 0 : index
    %4 = vector.load %arg3[%c0_7, %c0_8, %c0_9, %c0_10] : memref<1x4x8x8xf32, #tpu.memory_space<vmem>>, vector<1x4x8x8xf32>
    %5 = vector.shape_cast %4 : vector<1x4x8x8xf32> to vector<4x8x8xf32>
    %c0_11 = arith.constant 0 : index
    %c0_12 = arith.constant 0 : index
    %c0_13 = arith.constant 0 : index
    %6 = vector.load %arg4[%c0_11, %c0_12, %c0_13] : memref<1x8x8xf32, #tpu.memory_space<vmem>>, vector<1x8x8xf32>
    "tpu.trace_start"() <{level = 10 : i32, message = "hqd,hkd->hqk"}> : () -> ()
    %cst = arith.constant dense<0.000000e+00> : vector<4x8x8xf32>
    %7 = tpu.matmul %1, %3, %cst {dimension_numbers = #tpu.dot_dimension_numbers<[2], [2], [1], [1], [0, 0, 0, 1, 1, 1], [0], [0]>} : vector<4x8x8xf32>, vector<4x8x8xf32>, vector<4x8x8xf32> -> vector<4x8x8xf32>
    %cst_14 = arith.constant 0.000000e+00 : f32
    "tpu.trace_stop"() : () -> ()
    %8 = vector.broadcast %cst_14 : f32 to vector<1x8x8xf32>
    %9 = arith.cmpf ogt, %6, %8 : vector<1x8x8xf32>
    %cst_15 = arith.constant -1.000000e+30 : f32
    %10 = vector.shape_cast %9 : vector<1x8x8xi1> to vector<1x8x8xi1>
    %11 = vector.broadcast %10 : vector<1x8x8xi1> to vector<4x8x8xi1>
    %12 = vector.broadcast %cst_15 : f32 to vector<4x8x8xf32>
    %13 = arith.select %11, %12, %7 : vector<4x8x8xi1>, vector<4x8x8xf32>
    %cst_16 = arith.constant 0.353553385 : f32
    %14 = vector.broadcast %cst_16 : f32 to vector<4x8x8xf32>
    %15 = arith.mulf %13, %14 : vector<4x8x8xf32>
    %cst_17 = arith.constant dense<0xFF800000> : vector<4x8xf32>
    %16 = vector.multi_reduction <maximumf>, %15, %cst_17 [2] : vector<4x8x8xf32> to vector<4x8xf32>
    %17 = vector.shape_cast %16 : vector<4x8xf32> to vector<4x8x1xf32>
    %18 = vector.broadcast %17 : vector<4x8x1xf32> to vector<4x8x8xf32>
    %19 = arith.subf %15, %18 : vector<4x8x8xf32>
    %20 = math.exp %19 : vector<4x8x8xf32>
    %cst_18 = arith.constant dense<0.000000e+00> : vector<4x8xf32>
    %21 = vector.multi_reduction <add>, %20, %cst_18 [2] : vector<4x8x8xf32> to vector<4x8xf32>
    %22 = vector.shape_cast %21 : vector<4x8xf32> to vector<4x8x1xf32>
    %23 = tpu.reciprocal %22 {approx = true} : vector<4x8x1xf32> -> vector<4x8x1xf32>
    %24 = vector.broadcast %23 : vector<4x8x1xf32> to vector<4x8x8xf32>
    %25 = arith.mulf %20, %24 : vector<4x8x8xf32>
    "tpu.trace_start"() <{level = 10 : i32, message = "hqk,hkd->hqd"}> : () -> ()
    %cst_19 = arith.constant dense<0.000000e+00> : vector<4x8x8xf32>
    %26 = tpu.matmul %25, %5, %cst_19 {dimension_numbers = #tpu.dot_dimension_numbers<[2], [1], [1], [2], [0, 0, 0, 1, 1, 2], [0], [0]>} : vector<4x8x8xf32>, vector<4x8x8xf32>, vector<4x8x8xf32> -> vector<4x8x8xf32>
    "tpu.trace_stop"() : () -> ()
    %c0_20 = arith.constant 0 : index
    %c0_21 = arith.constant 0 : index
    %c0_22 = arith.constant 0 : index
    %c0_23 = arith.constant 0 : index
    %27 = vector.load %arg5[%c0_20, %c0_21, %c0_22, %c0_23] : memref<1x4x8x8xf32, #tpu.memory_space<vmem>>, vector<1x4x8x8xf32>
    %28 = vector.shape_cast %27 : vector<1x4x8x8xf32> to vector<4x8x8xf32>
    %29 = vector.shape_cast %26 : vector<4x8x8xf32> to vector<1x4x8x8xf32>
    tpu.vector_store %arg5[%c0_20, %c0_21, %c0_22, %c0_23], %29 {strides = array<i32>} : memref<1x4x8x8xf32, #tpu.memory_space<vmem>>, vector<1x4x8x8xf32>,
    return
  }
  func.func @transform_0(%arg0: i32) -> (i32, i32, i32, i32) {
    %c0_i32 = arith.constant 0 : i32
    %c0_i32_0 = arith.constant 0 : i32
    %c0_i32_1 = arith.constant 0 : i32
    %c0_i32_2 = arith.constant 0 : i32
    return %arg0, %c0_i32, %c0_i32_0, %c0_i32_1 : i32, i32, i32, i32
  }
  func.func @transform_1(%arg0: i32) -> (i32, i32, i32, i32) {
    %c0_i32 = arith.constant 0 : i32
    %c0_i32_0 = arith.constant 0 : i32
    %c0_i32_1 = arith.constant 0 : i32
    %c0_i32_2 = arith.constant 0 : i32
    return %arg0, %c0_i32, %c0_i32_0, %c0_i32_1 : i32, i32, i32, i32
  }
  func.func @transform_2(%arg0: i32) -> (i32, i32, i32, i32) {
    %c0_i32 = arith.constant 0 : i32
    %c0_i32_0 = arith.constant 0 : i32
    %c0_i32_1 = arith.constant 0 : i32
    %c0_i32_2 = arith.constant 0 : i32
    return %arg0, %c0_i32, %c0_i32_0, %c0_i32_1 : i32, i32, i32, i32
  }
  func.func @transform_3(%arg0: i32) -> (i32, i32, i32) {
    %c0_i32 = arith.constant 0 : i32
    %c0_i32_0 = arith.constant 0 : i32
    %c0_i32_1 = arith.constant 0 : i32
    return %arg0, %c0_i32, %c0_i32_0 : i32, i32, i32
  }
  func.func @transform_4(%arg0: i32) -> (i32, i32, i32, i32) {
    %c0_i32 = arith.constant 0 : i32
    %c0_i32_0 = arith.constant 0 : i32
    %c0_i32_1 = arith.constant 0 : i32
    %c0_i32_2 = arith.constant 0 : i32
    return %arg0, %c0_i32, %c0_i32_0, %c0_i32_1 : i32, i32, i32, i32
  }
}

module attributes {stable_mosaic.version = 11 : i64} {
  func.func @_matmul_kernel(%arg0: i32, %arg1: i32, %arg2: i32, %arg3: memref<16x32xf32, #tpu.memory_space<vmem>>, %arg4: memref<32x32xf32, #tpu.memory_space<vmem>>, %arg5: memref<16x32xf32, #tpu.memory_space<vmem>>, %arg6: memref<16x32xf32, #tpu.memory_space<vmem>>) attributes {dimension_semantics = [#tpu.dimension_semantics<parallel>, #tpu.dimension_semantics<parallel>, #tpu.dimension_semantics<arbitrary>], iteration_bounds = array<i64: 1, 1, 1>, scalar_prefetch = 0 : i64, scratch_operands = 1 : i64, tpu.core_type = #tpu.core_type<tc>, window_params = [{transform_indices = @transform_0, window_bounds = array<i64: 16, 32>}, {transform_indices = @transform_1, window_bounds = array<i64: 32, 32>}, {transform_indices = @transform_2, window_bounds = array<i64: 16, 32>}]} {
    %c0_i32 = arith.constant 0 : i32
    %0 = arith.cmpi eq, %arg2, %c0_i32 : i32
    %1 = arith.extui %0 : i1 to i32
    %c0_i32_0 = arith.constant 0 : i32
    %2 = arith.cmpi ne, %1, %c0_i32_0 : i32
    scf.if %2 {
      %cst_10 = arith.constant 0.000000e+00 : f32
      %12 = vector.broadcast %cst_10 : f32 to vector<16x32xf32>
      %c0_11 = arith.constant 0 : index
      %c0_12 = arith.constant 0 : index
      %13 = vector.load %arg6[%c0_11, %c0_12] : memref<16x32xf32, #tpu.memory_space<vmem>>, vector<16x32xf32>
      tpu.vector_store %arg6[%c0_11, %c0_12], %12 {strides = array<i32>} : memref<16x32xf32, #tpu.memory_space<vmem>>, vector<16x32xf32>,
    } else {
    }
    %c0 = arith.constant 0 : index
    %c0_1 = arith.constant 0 : index
    %3 = vector.load %arg6[%c0, %c0_1] : memref<16x32xf32, #tpu.memory_space<vmem>>, vector<16x32xf32>
    %c0_2 = arith.constant 0 : index
    %c0_3 = arith.constant 0 : index
    %4 = vector.load %arg3[%c0_2, %c0_3] : memref<16x32xf32, #tpu.memory_space<vmem>>, vector<16x32xf32>
    %c0_4 = arith.constant 0 : index
    %c0_5 = arith.constant 0 : index
    %5 = vector.load %arg4[%c0_4, %c0_5] : memref<32x32xf32, #tpu.memory_space<vmem>>, vector<32x32xf32>
    %cst = arith.constant dense<0.000000e+00> : vector<16x32xf32>
    %6 = tpu.matmul %4, %5, %cst {dimension_numbers = #tpu.dot_dimension_numbers<[1], [0], [0], [1], [0, 0, 1, 1], [], []>} : vector<16x32xf32>, vector<32x32xf32>, vector<16x32xf32> -> vector<16x32xf32>
    %7 = arith.addf %3, %6 : vector<16x32xf32>
    %c0_6 = arith.constant 0 : index
    %c0_7 = arith.constant 0 : index
    %8 = vector.load %arg6[%c0_6, %c0_7] : memref<16x32xf32, #tpu.memory_space<vmem>>, vector<16x32xf32>
    tpu.vector_store %arg6[%c0_6, %c0_7], %7 {strides = array<i32>} : memref<16x32xf32, #tpu.memory_space<vmem>>, vector<16x32xf32>,
    %c0_i32_8 = arith.constant 0 : i32
    %9 = arith.cmpi eq, %arg2, %c0_i32_8 : i32
    %10 = arith.extui %9 : i1 to i32
    %c0_i32_9 = arith.constant 0 : i32
    %11 = arith.cmpi ne, %10, %c0_i32_9 : i32
    scf.if %11 {
      %c0_10 = arith.constant 0 : index
      %c0_11 = arith.constant 0 : index
      %12 = vector.load %arg6[%c0_10, %c0_11] : memref<16x32xf32, #tpu.memory_space<vmem>>, vector<16x32xf32>
      %c0_12 = arith.constant 0 : index
      %c0_13 = arith.constant 0 : index
      %13 = vector.load %arg5[%c0_12, %c0_13] : memref<16x32xf32, #tpu.memory_space<vmem>>, vector<16x32xf32>
      tpu.vector_store %arg5[%c0_12, %c0_13], %12 {strides = array<i32>} : memref<16x32xf32, #tpu.memory_space<vmem>>, vector<16x32xf32>,
    } else {
    }
    return
  }
  func.func @transform_0(%arg0: i32, %arg1: i32, %arg2: i32) -> (i32, i32) {
    %c0_i32 = arith.constant 0 : i32
    return %arg0, %arg2 : i32, i32
  }
  func.func @transform_1(%arg0: i32, %arg1: i32, %arg2: i32) -> (i32, i32) {
    %c0_i32 = arith.constant 0 : i32
    return %arg2, %arg1 : i32, i32
  }
  func.func @transform_2(%arg0: i32, %arg1: i32, %arg2: i32) -> (i32, i32) {
    %c0_i32 = arith.constant 0 : i32
    return %arg0, %arg1 : i32, i32
  }
}

module attributes {stable_mosaic.version = 11 : i64} {
  func.func @_add_ln_kernel(%arg0: i32, %arg1: memref<16x32xf32, #tpu.memory_space<vmem>>, %arg2: memref<16x32xf32, #tpu.memory_space<vmem>>, %arg3: memref<1x32xf32, #tpu.memory_space<vmem>>, %arg4: memref<1x32xf32, #tpu.memory_space<vmem>>, %arg5: memref<16x32xf32, #tpu.memory_space<vmem>>) attributes {dimension_semantics = [#tpu.dimension_semantics<parallel>], iteration_bounds = array<i64: 1>, scalar_prefetch = 0 : i64, scratch_operands = 0 : i64, tpu.core_type = #tpu.core_type<tc>, window_params = [{transform_indices = @transform_0, window_bounds = array<i64: 16, 32>}, {transform_indices = @transform_1, window_bounds = array<i64: 16, 32>}, {pipeline_mode = #tpu.pipeline_mode<synchronous>, transform_indices = @transform_2, window_bounds = array<i64: 1, 32>}, {pipeline_mode = #tpu.pipeline_mode<synchronous>, transform_indices = @transform_3, window_bounds = array<i64: 1, 32>}, {transform_indices = @transform_4, window_bounds = array<i64: 16, 32>}]} {
    %c0 = arith.constant 0 : index
    %c0_0 = arith.constant 0 : index
    %0 = vector.load %arg1[%c0, %c0_0] : memref<16x32xf32, #tpu.memory_space<vmem>>, vector<16x32xf32>
    %c0_1 = arith.constant 0 : index
    %c0_2 = arith.constant 0 : index
    %1 = vector.load %arg2[%c0_1, %c0_2] : memref<16x32xf32, #tpu.memory_space<vmem>>, vector<16x32xf32>
    %2 = arith.addf %0, %1 : vector<16x32xf32>
    %cst = arith.constant dense<0.000000e+00> : vector<16xf32>
    %3 = vector.multi_reduction <add>, %2, %cst [1] : vector<16x32xf32> to vector<16xf32>
    %4 = vector.shape_cast %3 : vector<16xf32> to vector<16x1xf32>
    %cst_3 = arith.constant 3.200000e+01 : f32
    %5 = vector.broadcast %cst_3 : f32 to vector<16x1xf32>
    %6 = arith.divf %4, %5 : vector<16x1xf32>
    %7 = vector.broadcast %6 : vector<16x1xf32> to vector<16x32xf32>
    %8 = arith.subf %2, %7 : vector<16x32xf32>
    %9 = arith.mulf %8, %8 : vector<16x32xf32>
    %cst_4 = arith.constant dense<0.000000e+00> : vector<16xf32>
    %10 = vector.multi_reduction <add>, %9, %cst_4 [1] : vector<16x32xf32> to vector<16xf32>
    %11 = vector.shape_cast %10 : vector<16xf32> to vector<16x1xf32>
    %cst_5 = arith.constant 3.200000e+01 : f32
    %12 = vector.broadcast %cst_5 : f32 to vector<16x1xf32>
    %13 = arith.divf %11, %12 : vector<16x1xf32>
    %cst_6 = arith.constant 9.99999974E-6 : f32
    %14 = vector.broadcast %cst_6 : f32 to vector<16x1xf32>
    %15 = arith.addf %13, %14 : vector<16x1xf32>
    %16 = math.rsqrt %15 : vector<16x1xf32>
    %17 = vector.broadcast %16 : vector<16x1xf32> to vector<16x32xf32>
    %18 = arith.mulf %8, %17 : vector<16x32xf32>
    %c0_7 = arith.constant 0 : index
    %c0_8 = arith.constant 0 : index
    %19 = vector.load %arg3[%c0_7, %c0_8] : memref<1x32xf32, #tpu.memory_space<vmem>>, vector<1x32xf32>
    %20 = vector.broadcast %19 : vector<1x32xf32> to vector<16x32xf32>
    %21 = arith.mulf %18, %20 : vector<16x32xf32>
    %c0_9 = arith.constant 0 : index
    %c0_10 = arith.constant 0 : index
    %22 = vector.load %arg4[%c0_9, %c0_10] : memref<1x32xf32, #tpu.memory_space<vmem>>, vector<1x32xf32>
    %23 = vector.broadcast %22 : vector<1x32xf32> to vector<16x32xf32>
    %24 = arith.addf %21, %23 : vector<16x32xf32>
    %c0_11 = arith.constant 0 : index
    %c0_12 = arith.constant 0 : index
    %25 = vector.load %arg5[%c0_11, %c0_12] : memref<16x32xf32, #tpu.memory_space<vmem>>, vector<16x32xf32>
    tpu.vector_store %arg5[%c0_11, %c0_12], %24 {strides = array<i32>} : memref<16x32xf32, #tpu.memory_space<vmem>>, vector<16x32xf32>,
    return
  }
  func.func @transform_0(%arg0: i32) -> (i32, i32) {
    %c0_i32 = arith.constant 0 : i32
    %c0_i32_0 = arith.constant 0 : i32
    return %arg0, %c0_i32 : i32, i32
  }
  func.func @transform_1(%arg0: i32) -> (i32, i32) {
    %c0_i32 = arith.constant 0 : i32
    %c0_i32_0 = arith.constant 0 : i32
    return %arg0, %c0_i32 : i32, i32
  }
  func.func @transform_2(%arg0: i32) -> (i32, i32) {
    %c0_i32 = arith.constant 0 : i32
    %c0_i32_0 = arith.constant 0 : i32
    %c0_i32_1 = arith.constant 0 : i32
    return %c0_i32, %c0_i32_0 : i32, i32
  }
  func.func @transform_3(%arg0: i32) -> (i32, i32) {
    %c0_i32 = arith.constant 0 : i32
    %c0_i32_0 = arith.constant 0 : i32
    %c0_i32_1 = arith.constant 0 : i32
    return %c0_i32, %c0_i32_0 : i32, i32
  }
  func.func @transform_4(%arg0: i32) -> (i32, i32) {
    %c0_i32 = arith.constant 0 : i32
    %c0_i32_0 = arith.constant 0 : i32
    return %arg0, %c0_i32 : i32, i32
  }
}

module attributes {stable_mosaic.version = 11 : i64} {
  func.func @_ffn_kernel(%arg0: i32, %arg1: memref<16x32xf32, #tpu.memory_space<vmem>>, %arg2: memref<32x128xf32, #tpu.memory_space<vmem>>, %arg3: memref<1x128xf32, #tpu.memory_space<vmem>>, %arg4: memref<128x32xf32, #tpu.memory_space<vmem>>, %arg5: memref<1x32xf32, #tpu.memory_space<vmem>>, %arg6: memref<16x32xf32, #tpu.memory_space<vmem>>) attributes {dimension_semantics = [#tpu.dimension_semantics<parallel>], iteration_bounds = array<i64: 1>, scalar_prefetch = 0 : i64, scratch_operands = 0 : i64, tpu.core_type = #tpu.core_type<tc>, window_params = [{transform_indices = @transform_0, window_bounds = array<i64: 16, 32>}, {pipeline_mode = #tpu.pipeline_mode<synchronous>, transform_indices = @transform_1, window_bounds = array<i64: 32, 128>}, {pipeline_mode = #tpu.pipeline_mode<synchronous>, transform_indices = @transform_2, window_bounds = array<i64: 1, 128>}, {pipeline_mode = #tpu.pipeline_mode<synchronous>, transform_indices = @transform_3, window_bounds = array<i64: 128, 32>}, {pipeline_mode = #tpu.pipeline_mode<synchronous>, transform_indices = @transform_4, window_bounds = array<i64: 1, 32>}, {transform_indices = @transform_5, window_bounds = array<i64: 16, 32>}]} {
    %c0 = arith.constant 0 : index
    %c0_0 = arith.constant 0 : index
    %0 = vector.load %arg1[%c0, %c0_0] : memref<16x32xf32, #tpu.memory_space<vmem>>, vector<16x32xf32>
    %c0_1 = arith.constant 0 : index
    %c0_2 = arith.constant 0 : index
    %1 = vector.load %arg2[%c0_1, %c0_2] : memref<32x128xf32, #tpu.memory_space<vmem>>, vector<32x128xf32>
    %cst = arith.constant dense<0.000000e+00> : vector<16x128xf32>
    %2 = tpu.matmul %0, %1, %cst {dimension_numbers = #tpu.dot_dimension_numbers<[1], [0], [0], [1], [0, 0, 1, 1], [], []>} : vector<16x32xf32>, vector<32x128xf32>, vector<16x128xf32> -> vector<16x128xf32>
    %c0_3 = arith.constant 0 : index
    %c0_4 = arith.constant 0 : index
    %3 = vector.load %arg3[%c0_3, %c0_4] : memref<1x128xf32, #tpu.memory_space<vmem>>, vector<1x128xf32>
    %4 = vector.broadcast %3 : vector<1x128xf32> to vector<16x128xf32>
    %5 = arith.addf %2, %4 : vector<16x128xf32>
    %cst_5 = arith.constant 0.000000e+00 : f32
    %6 = vector.broadcast %cst_5 : f32 to vector<16x128xf32>
    %7 = arith.maximumf %5, %6 : vector<16x128xf32>
    %c0_6 = arith.constant 0 : index
    %c0_7 = arith.constant 0 : index
    %8 = vector.load %arg4[%c0_6, %c0_7] : memref<128x32xf32, #tpu.memory_space<vmem>>, vector<128x32xf32>
    %cst_8 = arith.constant dense<0.000000e+00> : vector<16x32xf32>
    %9 = tpu.matmul %7, %8, %cst_8 {dimension_numbers = #tpu.dot_dimension_numbers<[1], [0], [0], [1], [0, 0, 1, 1], [], []>} : vector<16x128xf32>, vector<128x32xf32>, vector<16x32xf32> -> vector<16x32xf32>
    %c0_9 = arith.constant 0 : index
    %c0_10 = arith.constant 0 : index
    %10 = vector.load %arg5[%c0_9, %c0_10] : memref<1x32xf32, #tpu.memory_space<vmem>>, vector<1x32xf32>
    %11 = vector.broadcast %10 : vector<1x32xf32> to vector<16x32xf32>
    %12 = arith.addf %9, %11 : vector<16x32xf32>
    %c0_11 = arith.constant 0 : index
    %c0_12 = arith.constant 0 : index
    %13 = vector.load %arg6[%c0_11, %c0_12] : memref<16x32xf32, #tpu.memory_space<vmem>>, vector<16x32xf32>
    tpu.vector_store %arg6[%c0_11, %c0_12], %12 {strides = array<i32>} : memref<16x32xf32, #tpu.memory_space<vmem>>, vector<16x32xf32>,
    return
  }
  func.func @transform_0(%arg0: i32) -> (i32, i32) {
    %c0_i32 = arith.constant 0 : i32
    %c0_i32_0 = arith.constant 0 : i32
    return %arg0, %c0_i32 : i32, i32
  }
  func.func @transform_1(%arg0: i32) -> (i32, i32) {
    %c0_i32 = arith.constant 0 : i32
    %c0_i32_0 = arith.constant 0 : i32
    %c0_i32_1 = arith.constant 0 : i32
    return %c0_i32, %c0_i32_0 : i32, i32
  }
  func.func @transform_2(%arg0: i32) -> (i32, i32) {
    %c0_i32 = arith.constant 0 : i32
    %c0_i32_0 = arith.constant 0 : i32
    %c0_i32_1 = arith.constant 0 : i32
    return %c0_i32, %c0_i32_0 : i32, i32
  }
  func.func @transform_3(%arg0: i32) -> (i32, i32) {
    %c0_i32 = arith.constant 0 : i32
    %c0_i32_0 = arith.constant 0 : i32
    %c0_i32_1 = arith.constant 0 : i32
    return %c0_i32, %c0_i32_0 : i32, i32
  }
  func.func @transform_4(%arg0: i32) -> (i32, i32) {
    %c0_i32 = arith.constant 0 : i32
    %c0_i32_0 = arith.constant 0 : i32
    %c0_i32_1 = arith.constant 0 : i32
    return %c0_i32, %c0_i32_0 : i32, i32
  }
  func.func @transform_5(%arg0: i32) -> (i32, i32) {
    %c0_i32 = arith.constant 0 : i32
    %c0_i32_0 = arith.constant 0 : i32
    return %arg0, %c0_i32 : i32, i32
  }
}

module attributes {stable_mosaic.version = 11 : i64} {
  func.func @_matmul_kernel(%arg0: i32, %arg1: i32, %arg2: i32, %arg3: memref<16x32xf32, #tpu.memory_space<vmem>>, %arg4: memref<32x64xf32, #tpu.memory_space<vmem>>, %arg5: memref<16x64xf32, #tpu.memory_space<vmem>>, %arg6: memref<16x64xf32, #tpu.memory_space<vmem>>) attributes {dimension_semantics = [#tpu.dimension_semantics<parallel>, #tpu.dimension_semantics<parallel>, #tpu.dimension_semantics<arbitrary>], iteration_bounds = array<i64: 1, 1, 1>, scalar_prefetch = 0 : i64, scratch_operands = 1 : i64, tpu.core_type = #tpu.core_type<tc>, window_params = [{transform_indices = @transform_0, window_bounds = array<i64: 16, 32>}, {transform_indices = @transform_1, window_bounds = array<i64: 32, 64>}, {transform_indices = @transform_2, window_bounds = array<i64: 16, 64>}]} {
    %c0_i32 = arith.constant 0 : i32
    %0 = arith.cmpi eq, %arg2, %c0_i32 : i32
    %1 = arith.extui %0 : i1 to i32
    %c0_i32_0 = arith.constant 0 : i32
    %2 = arith.cmpi ne, %1, %c0_i32_0 : i32
    scf.if %2 {
      %cst_10 = arith.constant 0.000000e+00 : f32
      %12 = vector.broadcast %cst_10 : f32 to vector<16x64xf32>
      %c0_11 = arith.constant 0 : index
      %c0_12 = arith.constant 0 : index
      %13 = vector.load %arg6[%c0_11, %c0_12] : memref<16x64xf32, #tpu.memory_space<vmem>>, vector<16x64xf32>
      tpu.vector_store %arg6[%c0_11, %c0_12], %12 {strides = array<i32>} : memref<16x64xf32, #tpu.memory_space<vmem>>, vector<16x64xf32>,
    } else {
    }
    %c0 = arith.constant 0 : index
    %c0_1 = arith.constant 0 : index
    %3 = vector.load %arg6[%c0, %c0_1] : memref<16x64xf32, #tpu.memory_space<vmem>>, vector<16x64xf32>
    %c0_2 = arith.constant 0 : index
    %c0_3 = arith.constant 0 : index
    %4 = vector.load %arg3[%c0_2, %c0_3] : memref<16x32xf32, #tpu.memory_space<vmem>>, vector<16x32xf32>
    %c0_4 = arith.constant 0 : index
    %c0_5 = arith.constant 0 : index
    %5 = vector.load %arg4[%c0_4, %c0_5] : memref<32x64xf32, #tpu.memory_space<vmem>>, vector<32x64xf32>
    %cst = arith.constant dense<0.000000e+00> : vector<16x64xf32>
    %6 = tpu.matmul %4, %5, %cst {dimension_numbers = #tpu.dot_dimension_numbers<[1], [0], [0], [1], [0, 0, 1, 1], [], []>} : vector<16x32xf32>, vector<32x64xf32>, vector<16x64xf32> -> vector<16x64xf32>
    %7 = arith.addf %3, %6 : vector<16x64xf32>
    %c0_6 = arith.constant 0 : index
    %c0_7 = arith.constant 0 : index
    %8 = vector.load %arg6[%c0_6, %c0_7] : memref<16x64xf32, #tpu.memory_space<vmem>>, vector<16x64xf32>
    tpu.vector_store %arg6[%c0_6, %c0_7], %7 {strides = array<i32>} : memref<16x64xf32, #tpu.memory_space<vmem>>, vector<16x64xf32>,
    %c0_i32_8 = arith.constant 0 : i32
    %9 = arith.cmpi eq, %arg2, %c0_i32_8 : i32
    %10 = arith.extui %9 : i1 to i32
    %c0_i32_9 = arith.constant 0 : i32
    %11 = arith.cmpi ne, %10, %c0_i32_9 : i32
    scf.if %11 {
      %c0_10 = arith.constant 0 : index
      %c0_11 = arith.constant 0 : index
      %12 = vector.load %arg6[%c0_10, %c0_11] : memref<16x64xf32, #tpu.memory_space<vmem>>, vector<16x64xf32>
      %c0_12 = arith.constant 0 : index
      %c0_13 = arith.constant 0 : index
      %13 = vector.load %arg5[%c0_12, %c0_13] : memref<16x64xf32, #tpu.memory_space<vmem>>, vector<16x64xf32>
      tpu.vector_store %arg5[%c0_12, %c0_13], %12 {strides = array<i32>} : memref<16x64xf32, #tpu.memory_space<vmem>>, vector<16x64xf32>,
    } else {
    }
    return
  }
  func.func @transform_0(%arg0: i32, %arg1: i32, %arg2: i32) -> (i32, i32) {
    %c0_i32 = arith.constant 0 : i32
    return %arg0, %arg2 : i32, i32
  }
  func.func @transform_1(%arg0: i32, %arg1: i32, %arg2: i32) -> (i32, i32) {
    %c0_i32 = arith.constant 0 : i32
    return %arg2, %arg1 : i32, i32
  }
  func.func @transform_2(%arg0: i32, %arg1: i32, %arg2: i32) -> (i32, i32) {
    %c0_i32 = arith.constant 0 : i32
    return %arg0, %arg1 : i32, i32
  }
}

module attributes {stable_mosaic.version = 11 : i64} {
  func.func @_generator_kernel(%arg0: i32, %arg1: memref<16x32xf32, #tpu.memory_space<vmem>>, %arg2: memref<32x17xf32, #tpu.memory_space<vmem>>, %arg3: memref<1x17xf32, #tpu.memory_space<vmem>>, %arg4: memref<16x17xf32, #tpu.memory_space<vmem>>) attributes {dimension_semantics = [#tpu.dimension_semantics<parallel>], iteration_bounds = array<i64: 1>, scalar_prefetch = 0 : i64, scratch_operands = 0 : i64, tpu.core_type = #tpu.core_type<tc>, window_params = [{transform_indices = @transform_0, window_bounds = array<i64: 16, 32>}, {pipeline_mode = #tpu.pipeline_mode<synchronous>, transform_indices = @transform_1, window_bounds = array<i64: 32, 17>}, {pipeline_mode = #tpu.pipeline_mode<synchronous>, transform_indices = @transform_2, window_bounds = array<i64: 1, 17>}, {transform_indices = @transform_3, window_bounds = array<i64: 16, 17>}]} {
    %c0 = arith.constant 0 : index
    %c0_0 = arith.constant 0 : index
    %0 = vector.load %arg1[%c0, %c0_0] : memref<16x32xf32, #tpu.memory_space<vmem>>, vector<16x32xf32>
    %c0_1 = arith.constant 0 : index
    %c0_2 = arith.constant 0 : index
    %1 = vector.load %arg2[%c0_1, %c0_2] : memref<32x17xf32, #tpu.memory_space<vmem>>, vector<32x17xf32>
    %cst = arith.constant dense<0.000000e+00> : vector<16x17xf32>
    %2 = tpu.matmul %0, %1, %cst {dimension_numbers = #tpu.dot_dimension_numbers<[1], [0], [0], [1], [0, 0, 1, 1], [], []>} : vector<16x32xf32>, vector<32x17xf32>, vector<16x17xf32> -> vector<16x17xf32>
    %c0_3 = arith.constant 0 : index
    %c0_4 = arith.constant 0 : index
    %3 = vector.load %arg3[%c0_3, %c0_4] : memref<1x17xf32, #tpu.memory_space<vmem>>, vector<1x17xf32>
    %4 = vector.broadcast %3 : vector<1x17xf32> to vector<16x17xf32>
    %5 = arith.addf %2, %4 : vector<16x17xf32>
    %cst_5 = arith.constant dense<0xFF800000> : vector<16xf32>
    %6 = vector.multi_reduction <maximumf>, %5, %cst_5 [1] : vector<16x17xf32> to vector<16xf32>
    %7 = vector.shape_cast %6 : vector<16xf32> to vector<16x1xf32>
    %8 = vector.broadcast %7 : vector<16x1xf32> to vector<16x17xf32>
    %9 = arith.subf %5, %8 : vector<16x17xf32>
    %10 = math.exp %9 : vector<16x17xf32>
    %cst_6 = arith.constant dense<0.000000e+00> : vector<16xf32>
    %11 = vector.multi_reduction <add>, %10, %cst_6 [1] : vector<16x17xf32> to vector<16xf32>
    %12 = vector.shape_cast %11 : vector<16xf32> to vector<16x1xf32>
    %13 = math.log %12 : vector<16x1xf32>
    %14 = vector.broadcast %13 : vector<16x1xf32> to vector<16x17xf32>
    %15 = arith.subf %9, %14 : vector<16x17xf32>
    %c0_7 = arith.constant 0 : index
    %c0_8 = arith.constant 0 : index
    %16 = vector.load %arg4[%c0_7, %c0_8] : memref<16x17xf32, #tpu.memory_space<vmem>>, vector<16x17xf32>
    tpu.vector_store %arg4[%c0_7, %c0_8], %15 {strides = array<i32>} : memref<16x17xf32, #tpu.memory_space<vmem>>, vector<16x17xf32>,
    return
  }
  func.func @transform_0(%arg0: i32) -> (i32, i32) {
    %c0_i32 = arith.constant 0 : i32
    %c0_i32_0 = arith.constant 0 : i32
    return %arg0, %c0_i32 : i32, i32
  }
  func.func @transform_1(%arg0: i32) -> (i32, i32) {
    %c0_i32 = arith.constant 0 : i32
    %c0_i32_0 = arith.constant 0 : i32
    %c0_i32_1 = arith.constant 0 : i32
    return %c0_i32, %c0_i32_0 : i32, i32
  }
  func.func @transform_2(%arg0: i32) -> (i32, i32) {
    %c0_i32 = arith.constant 0 : i32
    %c0_i32_0 = arith.constant 0 : i32
    %c0_i32_1 = arith.constant 0 : i32
    return %c0_i32, %c0_i32_0 : i32, i32
  }
  func.func @transform_3(%arg0: i32) -> (i32, i32) {
    %c0_i32 = arith.constant 0 : i32
    %c0_i32_0 = arith.constant 0 : i32
    return %arg0, %c0_i32 : i32, i32
  }
}

</mosaic_0001>

<bundles_post_ra>
// kernel: transformer_forward.50
= control target key start
LH: loop header
LB: loop body
LE: loop exit
PB: predicated region body
PF: predicated region fallthrough
CT: control target
= control target key end

     0   :  { %vm23_vm0 = vcmask 261120   ;;  %s136_s0 = inlined_call_operand.vmem [shape: f32[16,32], index: 0, kind: input, shape index: {}]   ;;  %s137_s1 = inlined_call_operand.vmem [shape: f32[16,32], index: 1, kind: input, shape index: {}]   ;;  %s138_s2 = inlined_call_operand.vmem [shape: f32[1,32], index: 2, kind: input, shape index: {}]   ;;  %s139_s3 = inlined_call_operand.vmem [shape: f32[1,32], index: 3, kind: input, shape index: {}]   ;;  %s140_s4 = inlined_call_operand.vmem [shape: f32[16,32], index: 4, kind: output, shape index: {}]  }
   0x1   :  { %v17_v0 = vld [vmem:[%s136_s0] sm:$0xff]  ;;  %v18_v2 = vld [vmem:[%s136_s0 + $0x8] sm:$0xff] }
   0x2   :  { %v19_v1 = vld [vmem:[%s137_s1] sm:$0xff]  ;;  %v20_v4 = vld [vmem:[%s137_s1 + $0x8] sm:$0xff] }
   0x3   :  { %v21_v3 = vadd.f32 %v19_v1, %v17_v0  ;;  %v22_v5 = vadd.f32 %v20_v4, %v18_v2  ;;  %v75_v25 = vld [vmem:[%s138_s2] ss:$0 sm:$0xff] }
   0x4   :  { %v76_v27 = vld [vmem:[%s139_s3] ss:$0 sm:$0xff] }
   0x5   :  { %v24_v6 = vsel %vm23_vm0, %v21_v3, 0.0  ;;  %v27_v7 = vsel %vm23_vm0, %v22_v5, 0.0 }
   0x6   :  { %25 = vadd.xlane.f32.xlu0 %v24_v6 }
   0xa   :  { %28 = vadd.xlane.f32.xlu0 %v27_v7 }
  0x93   :  { %v26_v8 = vpop.xlane.xlu0 %25 }
  0x94   :  { %v31_v9 = vmul.f32 0.03125, %v26_v8 }
  0x96   :  { %v33_v10 = vsub.f32 %v21_v3, %v31_v9 }
  0x97   :  { %v29_v11 = vpop.xlane.xlu0 %28 }
  0x98   :  { %v32_v12 = vmul.f32 0.03125, %v29_v11  ;;  %v35_v13 = vmul.f32 %v33_v10, %v33_v10 }
  0x9a   :  { %v34_v14 = vsub.f32 %v22_v5, %v32_v12  ;;  %v37_v15 = vsel %vm23_vm0, %v35_v13, 0.0 }
  0x9b   :  { %38 = vadd.xlane.f32.xlu1 %v37_v15 }
  0x9c   :  { %v36_v16 = vmul.f32 %v34_v14, %v34_v14 }
  0x9e   :  { %v40_v17 = vsel %vm23_vm0, %v36_v16, 0.0 }
  0x9f   :  { %41 = vadd.xlane.f32.xlu1 %v40_v17 }
 0x128   :  { %v39_v18 = vpop.xlane.xlu1 %38 }
 0x129   :  { %v43_v19 = vmul.f32 0.03125, %v39_v18 }
 0x12b   :  { %v45_v20 = vadd.f32 1e-05, %v43_v19 }
 0x12c   :  { %v42_v21 = vpop.xlane.xlu1 %41 }
 0x12d   :  { %77 = vrsqrt.f32 %v45_v20  ;;  %v44_v22 = vmul.f32 0.03125, %v42_v21 }
 0x12f   :  { %v46_v23 = vadd.f32 1e-05, %v44_v22 }
 0x131   :  { %79 = vrsqrt.f32 %v46_v23 }
 0x137   :  { %v78_v24 = vpop.eup %77 }
 0x138   :  { %v49_v26 = vmul.f32 %v78_v24, %v33_v10 }
 0x13a   :  { %v58_v28 = vmul.f32 %v75_v25, %v49_v26 }
 0x13b   :  { %v80_v29 = vpop.eup %79 }
 0x13c   :  { %v67_v30 = vadd.f32 %v76_v27, %v58_v28  ;;  %v50_v31 = vmul.f32 %v80_v29, %v34_v14 }
 0x13e   :  { %69 = vst.msk [vmem:[%s140_s4] sm:$0xff] %vm23_vm0, %v67_v30  ;;  %v59_v32 = vmul.f32 %v75_v25, %v50_v31 }
 0x140   :  { %v68_v33 = vadd.f32 %v76_v27, %v59_v32 }
 0x142   :  { %70 = vst.msk [vmem:[%s140_s4 + $0x8] sm:$0xff] %vm23_vm0, %v68_v33 }

// kernel: transformer_forward.49
= control target key start
LH: loop header
LB: loop body
LE: loop exit
PB: predicated region body
PF: predicated region fallthrough
CT: control target
= control target key end

     0   :  { %vm15_vm0 = vcmask 261120   ;;  %v151_v3 = vmov 0.0   ;;  %s199_s1 = inlined_call_operand.vmem [shape: f32[32,32], index: 1, kind: input, shape index: {}]   ;;  %s200_s0 = inlined_call_operand.vmem [shape: f32[16,32], index: 0, kind: input, shape index: {}]   ;;  %s201_s2 = inlined_call_operand.vmem [shape: f32[16,32], index: 2, kind: output, shape index: {}]  }
   0x1   :  { %v22_v0 = vld [vmem:[%s199_s1] sm:$0xff]  ;;  %v23_v1 = vld [vmem:[%s199_s1 + $0x8] sm:$0xff]  ;;  %v24_v2 = vld [vmem:[%s199_s1 + $0x10] sm:$0xff]  ;;  %17 = vst.msk [vmem:[#allocation2 + $0x8] sm:$0xff] %vm15_vm0, %v151_v3 }
   0x2   :  { %16 = vst.msk [vmem:[#allocation2] sm:$0xff] %vm15_vm0, %v151_v3  ;;  %v142_v4 = vpack.c.bf16 %v23_v1, %v22_v0  ;;  %v25_v5 = vld [vmem:[%s199_s1 + $0x18] sm:$0xff]  ;;  %v20_v6 = vld [vmem:[%s200_s0] sm:$0xff]  ;;  %v21_v8 = vld [vmem:[%s200_s0 + $0x8] sm:$0xff] }
   0x3   :  { %v146_v7 = vpack.c.bf16 %v25_v5, %v24_v2  ;;  %139 = vmatprep.mubr.msk.f32.mxu0 %vm15_vm0, %v20_v6 }
   0x4   :  { %143 = vmatprep.subr.bf16.mxu0 %v142_v4 }
   0x5   :  { %145 = vmatpush3.bf16.msra.mxu0 %v142_v4 }
   0x6   :  { %147 = vmatprep.subr.bf16.mxu0 %v146_v7 }
   0x8   :  { %v19_v9 = vld [vmem:[#allocation2 + $0x8] sm:$0xff] }
   0x9   :  { %149 = vmatpush3.bf16.msra.mxu0 %v146_v7  ;;  %v18_v10 = vld [vmem:[#allocation2] sm:$0xff] }
   0xc   :  { %140 = vmatmul.mubr.msk.f32.vlgmr.msra.gmra.mrb[0].mxu0 %vm15_vm0, %v21_v8 }
  0xdf   :  { %v141_v11 = vpop.f32.mrb[0].mxu0 }
  0xe0   :  { %v109_v12 = vadd.f32 %v141_v11, %v19_v9  ;;  %v99_v13 = vpop.f32.mrb[1].mxu0 }
  0xe1   :  { %v108_v14 = vadd.f32 %v99_v13, %v18_v10 }
  0xe2   :  { %111 = vst.msk [vmem:[#allocation2 + $0x8] sm:$0xff] %vm15_vm0, %v109_v12 }
  0xe3   :  { %110 = vst.msk [vmem:[#allocation2] sm:$0xff] %vm15_vm0, %v108_v14 }
  0xe9   :  { %v116_v15 = vld [vmem:[#allocation2 + $0x8] sm:$0xff] }
  0xea   :  { %118 = vst.msk [vmem:[%s201_s2 + $0x8] sm:$0xff] %vm15_vm0, %v116_v15  ;;  %v115_v16 = vld [vmem:[#allocation2] sm:$0xff] }
  0xeb   :  { %117 = vst.msk [vmem:[%s201_s2] sm:$0xff] %vm15_vm0, %v115_v16 }

// kernel: transformer_forward.47
= control target key start
LH: loop header
LB: loop body
LE: loop exit
PB: predicated region body
PF: predicated region fallthrough
CT: control target
= control target key end

     0   :  { %vm26_vm0 = vcmask 261120   ;;  %vm15_vm1 = vcmask 785408   ;;  %v152_v3 = vmov 0.0   ;;  %s200_s1 = inlined_call_operand.vmem [shape: f32[32,96], index: 1, kind: input, shape index: {}]   ;;  %s201_s0 = inlined_call_operand.vmem [shape: f32[16,32], index: 0, kind: input, shape index: {}]   ;;  %s202_s2 = inlined_call_operand.vmem [shape: f32[16,96], index: 2, kind: output, shape index: {}]  }
   0x1   :  { %v22_v0 = vld [vmem:[%s200_s1] sm:$0xff]  ;;  %v23_v1 = vld [vmem:[%s200_s1 + $0x8] sm:$0xff]  ;;  %v24_v2 = vld [vmem:[%s200_s1 + $0x10] sm:$0xff]  ;;  %17 = vst.msk [vmem:[#allocation2 + $0x8] sm:$0xff] %vm15_vm1, %v152_v3 }
   0x2   :  { %16 = vst.msk [vmem:[#allocation2] sm:$0xff] %vm15_vm1, %v152_v3  ;;  %v143_v4 = vpack.c.bf16 %v23_v1, %v22_v0  ;;  %v25_v5 = vld [vmem:[%s200_s1 + $0x18] sm:$0xff]  ;;  %v20_v6 = vld [vmem:[%s201_s0] sm:$0xff]  ;;  %v21_v8 = vld [vmem:[%s201_s0 + $0x8] sm:$0xff] }
   0x3   :  { %v147_v7 = vpack.c.bf16 %v25_v5, %v24_v2  ;;  %140 = vmatprep.mubr.msk.f32.mxu0 %vm26_vm0, %v20_v6 }
   0x4   :  { %144 = vmatprep.subr.bf16.mxu0 %v143_v4 }
   0x5   :  { %146 = vmatpush3.bf16.msra.mxu0 %v143_v4 }
   0x6   :  { %148 = vmatprep.subr.bf16.mxu0 %v147_v7 }
   0x8   :  { %v19_v9 = vld [vmem:[#allocation2 + $0x8] sm:$0xff] }
   0x9   :  { %150 = vmatpush3.bf16.msra.mxu0 %v147_v7  ;;  %v18_v10 = vld [vmem:[#allocation2] sm:$0xff] }
   0xc   :  { %141 = vmatmul.mubr.msk.f32.vlgmr.msra.gmra.mrb[0].mxu0 %vm26_vm0, %v21_v8 }
  0xdf   :  { %v142_v11 = vpop.f32.mrb[0].mxu0 }
  0xe0   :  { %v109_v12 = vadd.f32 %v142_v11, %v19_v9  ;;  %v99_v13 = vpop.f32.mrb[1].mxu0 }
  0xe1   :  { %v108_v14 = vadd.f32 %v99_v13, %v18_v10 }
  0xe2   :  { %112 = vst.msk [vmem:[#allocation2 + $0x8] sm:$0xff] %vm15_vm1, %v109_v12 }
  0xe3   :  { %111 = vst.msk [vmem:[#allocation2] sm:$0xff] %vm15_vm1, %v108_v14 }
  0xe9   :  { %v117_v15 = vld [vmem:[#allocation2 + $0x8] sm:$0xff] }
  0xea   :  { %119 = vst.msk [vmem:[%s202_s2 + $0x8] sm:$0xff] %vm15_vm1, %v117_v15  ;;  %v116_v16 = vld [vmem:[#allocation2] sm:$0xff] }
  0xeb   :  { %118 = vst.msk [vmem:[%s202_s2] sm:$0xff] %vm15_vm1, %v116_v16 }

// kernel: transformer_forward.48
= control target key start
LH: loop header
LB: loop body
LE: loop exit
PB: predicated region body
PF: predicated region fallthrough
CT: control target
= control target key end

     0   :  { %s1164_s15 = smov 0   ;;  %s1252_s0 = inlined_call_operand.vmem [shape: f32[2,4,8,8], index: 0, kind: input, shape index: {}]   ;;  %s1253_s1 = inlined_call_operand.vmem [shape: f32[2,4,8,8], index: 1, kind: input, shape index: {}]   ;;  %s1254_s2 = inlined_call_operand.vmem [shape: f32[2,4,8,8], index: 2, kind: input, shape index: {}]   ;;  %s1255_s3 = inlined_call_operand.vmem [shape: f32[2,8,8], index: 3, kind: input, shape index: {}]   ;;  %s1256_s4 = inlined_call_operand.vmem [shape: f32[2,4,8,8], index: 4, kind: output, shape index: {}]  }
   0x1 LB: > { %s1015_s16 = sadd.s32 4294967295, %s1135_s15   ;;  %p1019_p0 = scmp.ge.s32.totalorder %s1135_s15, 1  ;;  %s1135_s15 = sphi %s1164_s15, %s14_s15  }
   0x2   : > { %p191_p1 = scmp.lt.s32.totalorder %s1135_s15, 3 }
   0x4   : > { %p192_p2 = pnand %p1019_p0, %p191_p1 }
   0x5   : > { %p231_p3 = scmp.lt.s32.totalorder (!%p192_p2), %s1015_s16, 1  ;;  %v1137_v0 = vmov (!%p192_p2), 0.0   ;;  %vm1138_vm0 = vmmov (!%p192_p2), 0   ;;  %vm268_vm1 = vcmask (!%p192_p2), 64512  }
   0x6   : > { %195 = sbr.rel (%p192_p2) target bundleno = 770 (0x302), region = 36  ;;  %1063 = vmatprep.subr.mxu0 (!%p192_p2), %v1137_v0  ;;  %1065 = vmatprep.mubr.msk.f32.mxu0 (!%p192_p2), %vm1138_vm0, %v1137_v0 }
   0x7   : > { %1068 = vmatprep.subr.mxu1 (!%p192_p2), %v1137_v0  ;;  %1070 = vmatprep.mubr.msk.f32.mxu1 (!%p192_p2), %vm1138_vm0, %v1137_v0 }
   0xd   : > { %s1258_s16 = smov (!%p231_p3, %s1015_s16), 1 }
   0xe   : > { %s1181_s17 = sshll.u32 %s1258_s16, 5  ;;  %s1026_s24 = sshll.u32 %s1258_s16, 3 }
   0xf   : > { %s240_s20 = scalar_lea.vmem %s1253_s1, %s1181_s17  ;;  %s235_s23 = scalar_lea.vmem %s1252_s0, %s1181_s17 }
  0x10   : > { %v259_v1 = vld [vmem:[%s240_s20] sm:$0xff]  ;;  %v260_v2 = vld [vmem:[%s240_s20 + $0x8] sm:$0xff]  ;;  %v261_v5 = vld [vmem:[%s240_s20 + $0x10] sm:$0xff]  ;;  %s249_s27 = scalar_lea.vmem %s1255_s3, %s1026_s24  ;;  %s245_s30 = scalar_lea.vmem %s1254_s2, %s1181_s17 }
  0x11   : > { %1064 = vmatpush3.xpose.msk.msra.mxu0 %vm268_vm1, %v259_v1  ;;  %v255_v3 = vld [vmem:[%s235_s23] sm:$0xff]  ;;  %1069 = vmatpush3.xpose.msk.msra.mxu1 %vm268_vm1, %v260_v2  ;;  %v256_v4 = vld [vmem:[%s235_s23 + $0x8] sm:$0xff]  ;;  %v262_v6 = vld [vmem:[%s240_s20 + $0x18] sm:$0xff]  ;;  %s254_s7 = scalar_lea.vmem %s1256_s4, %s1181_s17 }
  0x12   : > { %1073 = vmatprep.subr.mxu0 %v1137_v0  ;;  %1078 = vmatprep.subr.mxu1 %v1137_v0  ;;  %v257_v7 = vld [vmem:[%s235_s23 + $0x10] sm:$0xff]  ;;  %v258_v8 = vld [vmem:[%s235_s23 + $0x18] sm:$0xff]  ;;  %v267_v9 = vld [vmem:[%s249_s27] sm:$0xff] }
  0x13   : > { %vm573_vm2 = vcmp.gt.f32.partialorder %v267_v9, 0.0  ;;  %v263_v50 = vld [vmem:[%s245_s30] sm:$0xff]  ;;  %v264_v51 = vld [vmem:[%s245_s30 + $0x8] sm:$0xff]  ;;  %v265_v58 = vld [vmem:[%s245_s30 + $0x10] sm:$0xff] }
  0x14   : > { %1066 = vmatmul.mubr.msk.f32.vlgmr.msra.gmra.mrb[0].mxu0 %vm268_vm1, %v255_v3  ;;  %1071 = vmatmul.mubr.msk.f32.vlgmr.msra.gmra.mrb[0].mxu1 %vm268_vm1, %v256_v4  ;;  %v266_v62 = vld [vmem:[%s245_s30 + $0x18] sm:$0xff] }
  0x15   : > { %1074 = vmatpush3.xpose.msk.msra.mxu0 %vm268_vm1, %v261_v5  ;;  %1075 = vmatprep.mubr.msk.f32.mxu0 %vm1138_vm0, %v1137_v0 }
  0x16   : > { %1079 = vmatpush3.xpose.msk.msra.mxu1 %vm268_vm1, %v262_v6  ;;  %1080 = vmatprep.mubr.msk.f32.mxu1 %vm1138_vm0, %v1137_v0 }
  0x17   : > { %1083 = vmatprep.subr.mxu0 %v1137_v0  ;;  %1088 = vmatprep.subr.mxu1 %v1137_v0 }
  0x18   : > { %1076 = vmatmul.mubr.msk.f32.vlgmr.msra.gmra.mrb[2].mxu0 %vm268_vm1, %v257_v7 }
  0x19   : > { %1081 = vmatmul.mubr.msk.f32.vlgmr.msra.gmra.mrb[2].mxu1 %vm268_vm1, %v258_v8  ;;  %1085 = vmatprep.mubr.msk.f32.mxu0 %vm1138_vm0, %v1137_v0 }
  0x1a   : > { %1090 = vmatprep.mubr.msk.f32.mxu1 %vm1138_vm0, %v1137_v0  ;;  %1084 = vmatpush3.msra.mxu0 %v263_v50 }
  0x1b   : > { %1093 = vmatprep.subr.mxu0 %v1137_v0  ;;  %1089 = vmatpush3.msra.mxu1 %v264_v51 }
  0x1c   : > { %1098 = vmatprep.subr.mxu1 %v1137_v0 }
  0xe7   : > { %v341_v10 = vpop.f32.mrb[0].mxu0  ;;  %v417_v11 = vpop.f32.mrb[0].mxu1 }
  0xe8   : > { %v576_v12 = vsel %vm573_vm2, -1e+30, %v341_v10  ;;  %v1067_v13 = vpop.f32.mrb[1].mxu0  ;;  %v577_v14 = vsel %vm573_vm2, -1e+30, %v417_v11  ;;  %v1072_v15 = vpop.f32.mrb[1].mxu1 }
  0xe9   : > { %v580_v16 = vmul.f32 0.35355338, %v576_v12  ;;  %v581_v17 = vmul.f32 0.35355338, %v577_v14 }
  0xeb   : > { %v493_v18 = vpop.f32.mrb[2].mxu0  ;;  %v584_v19 = vsel %vm268_vm1, %v580_v16, -inf  ;;  %v587_v26 = vsel %vm268_vm1, %v581_v17, -inf }
  0xec   : > { %v578_v20 = vsel %vm573_vm2, -1e+30, %v493_v18  ;;  %585 = vmax.xlane.f32.xlu0 %v584_v19  ;;  %v1077_v21 = vpop.f32.mrb[3].mxu0  ;;  %v569_v22 = vpop.f32.mrb[2].mxu1 }
  0xed   : > { %v582_v23 = vmul.f32 0.35355338, %v578_v20  ;;  %v579_v24 = vsel %vm573_vm2, -1e+30, %v569_v22  ;;  %v1082_v25 = vpop.f32.mrb[3].mxu1 }
  0xee   : > { %v583_v27 = vmul.f32 0.35355338, %v579_v24 }
  0xef   : > { %v590_v28 = vsel %vm268_vm1, %v582_v23, -inf }
  0xf0   : > { %588 = vmax.xlane.f32.xlu0 %v587_v26  ;;  %591 = vmax.xlane.f32.xlu1 %v590_v28  ;;  %v593_v29 = vsel %vm268_vm1, %v583_v27, -inf }
  0xf4   : > { %594 = vmax.xlane.f32.xlu1 %v593_v29 }
 0x179   : > { %v586_v30 = vpop.xlane.xlu0 %585 }
 0x17a   : > { %v596_v31 = vsub.f32 %v580_v16, %v586_v30 }
 0x17c   : > { %v600_v32 = vmul.f32 1.442695, %v596_v31 }
 0x17d   : > { %v589_v33 = vpop.xlane.xlu0 %588  ;;  %v592_v34 = vpop.xlane.xlu1 %591 }
 0x17e   : > { %1113 = vpow2.f32 %v600_v32  ;;  %v597_v35 = vsub.f32 %v581_v17, %v589_v33  ;;  %v598_v36 = vsub.f32 %v582_v23, %v592_v34 }
 0x180   : > { %v602_v37 = vmul.f32 1.442695, %v597_v35  ;;  %v604_v38 = vmul.f32 1.442695, %v598_v36 }
 0x181   : > { %v595_v39 = vpop.xlane.xlu1 %594 }
 0x182   : > { %1115 = vpow2.f32 %v602_v37  ;;  %v599_v40 = vsub.f32 %v583_v27, %v595_v39 }
 0x183   : > { %1117 = vpow2.f32 %v604_v38 }
 0x184   : > { %v606_v41 = vmul.f32 1.442695, %v599_v40 }
 0x186   : > { %1119 = vpow2.f32 %v606_v41 }
 0x188   : > { %v1114_v42 = vpop.eup %1113 }
 0x189   : > { %v608_v43 = vsel %vm268_vm1, %v1114_v42, 0.0 }
 0x18a   : > { %609 = vadd.xlane.f32.xlu0 %v608_v43 }
 0x18c   : > { %v1116_v44 = vpop.eup %1115 }
 0x18d   : > { %v1118_v45 = vpop.eup %1117  ;;  %v611_v46 = vsel %vm268_vm1, %v1116_v44, 0.0 }
 0x18e   : > { %612 = vadd.xlane.f32.xlu1 %v611_v46  ;;  %v614_v47 = vsel %vm268_vm1, %v1118_v45, 0.0 }
 0x18f   : > { %615 = vadd.xlane.f32.xlu0 %v614_v47 }
 0x190   : > { %v1120_v48 = vpop.eup %1119 }
 0x191   : > { %v617_v49 = vsel %vm268_vm1, %v1120_v48, 0.0 }
 0x192   : > { %618 = vadd.xlane.f32.xlu1 %v617_v49 }
 0x217   : > { %v610_v52 = vpop.xlane.xlu0 %609 }
 0x218   : > { %1121 = vrcp.f32 %v610_v52 }
 0x21b   : > { %v613_v53 = vpop.xlane.xlu1 %612 }
 0x21c   : > { %v616_v54 = vpop.xlane.xlu0 %615  ;;  %1123 = vrcp.f32 %v613_v53 }
 0x21d   : > { %1125 = vrcp.f32 %v616_v54 }
 0x21f   : > { %v619_v55 = vpop.xlane.xlu1 %618 }
 0x220   : > { %1127 = vrcp.f32 %v619_v55 }
 0x222   : > { %v1122_v56 = vpop.eup %1121 }
 0x223   : > { %v624_v57 = vmul.f32 %v1122_v56, %v1114_v42 }
 0x225   : > { %1086 = vmatmul.mubr.msk.f32.vlgmr.msra.gmra.mrb[4].mxu0 %vm268_vm1, %v624_v57 }
 0x226   : > { %v1124_v59 = vpop.eup %1123  ;;  %1094 = vmatpush3.msra.mxu0 %v265_v58  ;;  %1095 = vmatprep.mubr.msk.f32.mxu0 %vm1138_vm0, %v1137_v0 }
 0x227   : > { %v1126_v60 = vpop.eup %1125  ;;  %v625_v61 = vmul.f32 %v1124_v59, %v1116_v44 }
 0x228   : > { %v626_v63 = vmul.f32 %v1126_v60, %v1118_v45 }
 0x229   : > { %1091 = vmatmul.mubr.msk.f32.vlgmr.msra.gmra.mrb[4].mxu1 %vm268_vm1, %v625_v61 }
 0x22a   : > { %v1128_v1 = vpop.eup %1127  ;;  %1096 = vmatmul.mubr.msk.f32.vlgmr.msra.gmra.mrb[6].mxu0 %vm268_vm1, %v626_v63  ;;  %1099 = vmatpush3.msra.mxu1 %v266_v62 }
 0x22b   : > { %v627_v2 = vmul.f32 %v1128_v1, %v1120_v48  ;;  %1100 = vmatprep.mubr.msk.f32.mxu1 %vm1138_vm0, %v1137_v0 }
 0x22d   : > { %1101 = vmatmul.mubr.msk.f32.vlgmr.msra.gmra.mrb[6].mxu1 %vm268_vm1, %v627_v2 }
 0x2f8   : > { %v697_v3 = vpop.f32.mrb[4].mxu0 }
 0x2f9   : > { %920 = vst.msk [vmem:[%s254_s7] sm:$0xff] %vm268_vm1, %v697_v3  ;;  %v1087_v4 = vpop.f32.mrb[5].mxu0 }
 0x2fc   : > { %v770_v5 = vpop.f32.mrb[4].mxu1 }
 0x2fd   : > { %921 = vst.msk [vmem:[%s254_s7 + $0x8] sm:$0xff] %vm268_vm1, %v770_v5  ;;  %v843_v6 = vpop.f32.mrb[6].mxu0  ;;  %v1092_v7 = vpop.f32.mrb[5].mxu1 }
 0x2fe   : > { %922 = vst.msk [vmem:[%s254_s7 + $0x10] sm:$0xff] %vm268_vm1, %v843_v6  ;;  %v1097_v8 = vpop.f32.mrb[7].mxu0 }
 0x300   : > { %v916_v9 = vpop.f32.mrb[6].mxu1 }
 0x301   : > { %923 = vst.msk [vmem:[%s254_s7 + $0x18] sm:$0xff] %vm268_vm1, %v916_v9  ;;  %v1102_v0 = vpop.f32.mrb[7].mxu1 }
 0x302 PF: > { %s14_s15 = sadd.s32 1, %s1135_s15  }
 0x303   : > { %p11_p4 = scmp.ge.s32.totalorder %s14_s15, 4  }
 0x305   :  { %13 = sbr.rel (!%p11_p4) target bundleno = 1 (0x1), region = 75 }

// kernel: transformer_forward.52
= control target key start
LH: loop header
LB: loop body
LE: loop exit
PB: predicated region body
PF: predicated region fallthrough
CT: control target
= control target key end

     0   :  { %vm26_vm0 = vcmask 261120   ;;  %vm15_vm1 = vcmask 523264   ;;  %v152_v3 = vmov 0.0   ;;  %s200_s1 = inlined_call_operand.vmem [shape: f32[32,64], index: 1, kind: input, shape index: {}]   ;;  %s201_s0 = inlined_call_operand.vmem [shape: f32[16,32], index: 0, kind: input, shape index: {}]   ;;  %s202_s2 = inlined_call_operand.vmem [shape: f32[16,64], index: 2, kind: output, shape index: {}]  }
   0x1   :  { %v22_v0 = vld [vmem:[%s200_s1] sm:$0xff]  ;;  %v23_v1 = vld [vmem:[%s200_s1 + $0x8] sm:$0xff]  ;;  %v24_v2 = vld [vmem:[%s200_s1 + $0x10] sm:$0xff]  ;;  %17 = vst.msk [vmem:[#allocation2 + $0x8] sm:$0xff] %vm15_vm1, %v152_v3 }
   0x2   :  { %16 = vst.msk [vmem:[#allocation2] sm:$0xff] %vm15_vm1, %v152_v3  ;;  %v143_v4 = vpack.c.bf16 %v23_v1, %v22_v0  ;;  %v25_v5 = vld [vmem:[%s200_s1 + $0x18] sm:$0xff]  ;;  %v20_v6 = vld [vmem:[%s201_s0] sm:$0xff]  ;;  %v21_v8 = vld [vmem:[%s201_s0 + $0x8] sm:$0xff] }
   0x3   :  { %v147_v7 = vpack.c.bf16 %v25_v5, %v24_v2  ;;  %140 = vmatprep.mubr.msk.f32.mxu0 %vm26_vm0, %v20_v6 }
   0x4   :  { %144 = vmatprep.subr.bf16.mxu0 %v143_v4 }
   0x5   :  { %146 = vmatpush3.bf16.msra.mxu0 %v143_v4 }
   0x6   :  { %148 = vmatprep.subr.bf16.mxu0 %v147_v7 }
   0x8   :  { %v19_v9 = vld [vmem:[#allocation2 + $0x8] sm:$0xff] }
   0x9   :  { %150 = vmatpush3.bf16.msra.mxu0 %v147_v7  ;;  %v18_v10 = vld [vmem:[#allocation2] sm:$0xff] }
   0xc   :  { %141 = vmatmul.mubr.msk.f32.vlgmr.msra.gmra.mrb[0].mxu0 %vm26_vm0, %v21_v8 }
  0xdf   :  { %v142_v11 = vpop.f32.mrb[0].mxu0 }
  0xe0   :  { %v109_v12 = vadd.f32 %v142_v11, %v19_v9  ;;  %v99_v13 = vpop.f32.mrb[1].mxu0 }
  0xe1   :  { %v108_v14 = vadd.f32 %v99_v13, %v18_v10 }
  0xe2   :  { %112 = vst.msk [vmem:[#allocation2 + $0x8] sm:$0xff] %vm15_vm1, %v109_v12 }
  0xe3   :  { %111 = vst.msk [vmem:[#allocation2] sm:$0xff] %vm15_vm1, %v108_v14 }
  0xe9   :  { %v117_v15 = vld [vmem:[#allocation2 + $0x8] sm:$0xff] }
  0xea   :  { %119 = vst.msk [vmem:[%s202_s2 + $0x8] sm:$0xff] %vm15_vm1, %v117_v15  ;;  %v116_v16 = vld [vmem:[#allocation2] sm:$0xff] }
  0xeb   :  { %118 = vst.msk [vmem:[%s202_s2] sm:$0xff] %vm15_vm1, %v116_v16 }

// kernel: transformer_forward.39
= control target key start
LH: loop header
LB: loop body
LE: loop exit
PB: predicated region body
PF: predicated region fallthrough
CT: control target
= control target key end

     0   :  { %vm33_vm0 = vcmask 261120   ;;  %s447_s1 = inlined_call_operand.vmem [shape: f32[32,128], index: 1, kind: input, shape index: {}]   ;;  %s448_s0 = inlined_call_operand.vmem [shape: f32[16,32], index: 0, kind: input, shape index: {}]   ;;  %s449_s3 = inlined_call_operand.vmem [shape: f32[128,32], index: 3, kind: input, shape index: {}]   ;;  %s450_s2 = inlined_call_operand.vmem [shape: f32[1,128], index: 2, kind: input, shape index: {}]   ;;  %s451_s4 = inlined_call_operand.vmem [shape: f32[1,32], index: 4, kind: input, shape index: {}]   ;;  %s452_s5 = inlined_call_operand.vmem [shape: f32[16,32], index: 5, kind: output, shape index: {}]  }
   0x1   :  { %v22_v0 = vld [vmem:[%s447_s1] sm:$0xff]  ;;  %v23_v1 = vld [vmem:[%s447_s1 + $0x8] sm:$0xff]  ;;  %v24_v2 = vld [vmem:[%s447_s1 + $0x10] sm:$0xff] }
   0x2   :  { %v295_v3 = vpack.c.bf16 %v23_v1, %v22_v0  ;;  %v25_v4 = vld [vmem:[%s447_s1 + $0x18] sm:$0xff]  ;;  %v20_v5 = vld [vmem:[%s448_s0] sm:$0xff]  ;;  %v118_v8 = vld [vmem:[%s449_s3 + $0x8] sm:$0xff] }
   0x3   :  { %v299_v6 = vpack.c.bf16 %v25_v4, %v24_v2  ;;  %257 = vmatprep.mubr.msk.f32.mxu0 %vm33_vm0, %v20_v5  ;;  %v117_v7 = vld [vmem:[%s449_s3] sm:$0xff]  ;;  %v119_v9 = vld [vmem:[%s449_s3 + $0x10] sm:$0xff]  ;;  %v120_v11 = vld [vmem:[%s449_s3 + $0x18] sm:$0xff] }
   0x4   :  { %296 = vmatprep.subr.bf16.mxu0 %v295_v3  ;;  %v303_v10 = vpack.c.bf16 %v118_v8, %v117_v7  ;;  %v307_v12 = vpack.c.bf16 %v120_v11, %v119_v9  ;;  %v121_v13 = vld [vmem:[%s449_s3 + $0x20] sm:$0xff]  ;;  %v122_v14 = vld [vmem:[%s449_s3 + $0x28] sm:$0xff]  ;;  %v123_v17 = vld [vmem:[%s449_s3 + $0x30] sm:$0xff] }
   0x5   :  { %298 = vmatpush3.bf16.msra.mxu0 %v295_v3  ;;  %v311_v15 = vpack.c.bf16 %v122_v14, %v121_v13  ;;  %v21_v16 = vld [vmem:[%s448_s0 + $0x8] sm:$0xff]  ;;  %v124_v18 = vld [vmem:[%s449_s3 + $0x38] sm:$0xff]  ;;  %v125_v20 = vld [vmem:[%s449_s3 + $0x40] sm:$0xff] }
   0x6   :  { %300 = vmatprep.subr.bf16.mxu0 %v299_v6  ;;  %304 = vmatprep.subr.bf16.mxu1 %v303_v10  ;;  %v315_v19 = vpack.c.bf16 %v124_v18, %v123_v17  ;;  %v126_v21 = vld [vmem:[%s449_s3 + $0x48] sm:$0xff]  ;;  %v127_v23 = vld [vmem:[%s449_s3 + $0x50] sm:$0xff]  ;;  %v128_v24 = vld [vmem:[%s449_s3 + $0x58] sm:$0xff] }
   0x7   :  { %306 = vmatpush3.bf16.msra.mxu1 %v303_v10  ;;  %v319_v22 = vpack.c.bf16 %v126_v21, %v125_v20  ;;  %v323_v25 = vpack.c.bf16 %v128_v24, %v127_v23  ;;  %v129_v26 = vld [vmem:[%s449_s3 + $0x60] sm:$0xff]  ;;  %v130_v27 = vld [vmem:[%s449_s3 + $0x68] sm:$0xff]  ;;  %v131_v29 = vld [vmem:[%s449_s3 + $0x70] sm:$0xff] }
   0x8   :  { %308 = vmatprep.subr.bf16.mxu1 %v307_v12  ;;  %v327_v28 = vpack.c.bf16 %v130_v27, %v129_v26  ;;  %v132_v30 = vld [vmem:[%s449_s3 + $0x78] sm:$0xff]  ;;  %v221_v32 = vld [vmem:[%s450_s2] ss:$0 sm:$0xff] }
   0x9   :  { %302 = vmatpush3.bf16.msra.mxu0 %v299_v6  ;;  %v331_v31 = vpack.c.bf16 %v132_v30, %v131_v29  ;;  %v224_v39 = vld [vmem:[%s451_s4] ss:$0 sm:$0xff] }
   0xb   :  { %310 = vmatpush3.bf16.msra.mxu1 %v307_v12 }
   0xc   :  { %258 = vmatmul.mubr.msk.f32.vlgmr.msra.gmra.mrb[0].mxu0 %vm33_vm0, %v21_v16  ;;  %312 = vmatprep.subr.bf16.mxu1 %v311_v15 }
   0xf   :  { %314 = vmatpush3.bf16.msra.mxu1 %v311_v15 }
  0x10   :  { %316 = vmatprep.subr.bf16.mxu1 %v315_v19 }
  0x13   :  { %318 = vmatpush3.bf16.msra.mxu1 %v315_v19 }
  0x14   :  { %320 = vmatprep.subr.bf16.mxu1 %v319_v22 }
  0x17   :  { %322 = vmatpush3.bf16.msra.mxu1 %v319_v22 }
  0x18   :  { %324 = vmatprep.subr.bf16.mxu1 %v323_v25 }
  0x1b   :  { %326 = vmatpush3.bf16.msra.mxu1 %v323_v25 }
  0x1c   :  { %328 = vmatprep.subr.bf16.mxu1 %v327_v28 }
  0x1f   :  { %330 = vmatpush3.bf16.msra.mxu1 %v327_v28 }
  0x20   :  { %332 = vmatprep.subr.bf16.mxu1 %v331_v31 }
  0x23   :  { %334 = vmatpush3.bf16.msra.mxu1 %v331_v31 }
  0xdf   :  { %v259_v33 = vpop.f32.mrb[0].mxu0 }
  0xe0   :  { %v112_v34 = vadd.f32 %v259_v33, %v221_v32  ;;  %v106_v35 = vpop.f32.mrb[1].mxu0 }
  0xe1   :  { %v107_v36 = vadd.f32 %v221_v32, %v106_v35 }
  0xe2   :  { %v116_v38 = vmax.f32 %v112_v34, 0.0 }
  0xe3   :  { %v115_v37 = vmax.f32 %v107_v36, 0.0 }
  0xe5   :  { %292 = vmatprep.mubr.f32.mxu1 %v115_v37 }
  0xe6   :  { %293 = vmatmul.mubr.f32.vlgmr.msra.gmra.mrb[0].mxu1 %v116_v38 }
 0x1b9   :  { %v294_v40 = vpop.f32.mrb[0].mxu1 }
 0x1ba   :  { %v212_v41 = vadd.f32 %v294_v40, %v224_v39  ;;  %v206_v42 = vpop.f32.mrb[1].mxu1 }
 0x1bb   :  { %v207_v43 = vadd.f32 %v224_v39, %v206_v42 }
 0x1bc   :  { %216 = vst.msk [vmem:[%s452_s5 + $0x8] sm:$0xff] %vm33_vm0, %v212_v41 }
 0x1bd   :  { %215 = vst.msk [vmem:[%s452_s5] sm:$0xff] %vm33_vm0, %v207_v43 }

// kernel: transformer_forward.69
= control target key start
LH: loop header
LB: loop body
LE: loop exit
PB: predicated region body
PF: predicated region fallthrough
CT: control target
= control target key end

     0   :  { %vm28_vm0 = vcmask 261120   ;;  %s278_s0 = inlined_call_operand.vmem [shape: f32[16,32], index: 0, kind: input, shape index: {}]   ;;  %s279_s1 = inlined_call_operand.vmem [shape: f32[32,17], index: 1, kind: input, shape index: {}]   ;;  %s280_s2 = inlined_call_operand.vmem [shape: f32[1,17], index: 2, kind: input, shape index: {}]   ;;  %s281_s3 = inlined_call_operand.hbm [shape: f32[16,17], index: 3, kind: output, shape index: {}]  }
   0x1   :  { %v17_v0 = vld [vmem:[%s279_s1] sm:$0xff]  ;;  %v18_v1 = vld [vmem:[%s279_s1 + $0x8] sm:$0xff]  ;;  %v19_v2 = vld [vmem:[%s279_s1 + $0x10] sm:$0xff] }
   0x2   :  { %v173_v3 = vpack.c.bf16 %v18_v1, %v17_v0  ;;  %v20_v4 = vld [vmem:[%s279_s1 + $0x18] sm:$0xff]  ;;  %v15_v5 = vld [vmem:[%s278_s0] sm:$0xff] }
   0x3   :  { %v177_v6 = vpack.c.bf16 %v20_v4, %v19_v2  ;;  %170 = vmatprep.mubr.msk.f32.mxu0 %vm28_vm0, %v15_v5 }
   0x4   :  { %8 = vsyncpa [#allocation3], 0  ;;  %174 = vmatprep.subr.bf16.mxu0 %v173_v3  ;;  %v16_v7 = vld [vmem:[%s278_s0 + $0x8] sm:$0xff]  ;;  %v153_v8 = vld [vmem:[%s280_s2] ss:$0 sm:$0xff]  ;;  %vm110_vm1 = vcmask 138240  }
   0x5   :  { %176 = vmatpush3.bf16.msra.mxu0 %v173_v3  ;;  %s216_s0 = smov [#allocation2]  }
   0x6   :  { %178 = vmatprep.subr.bf16.mxu0 %v177_v6  ;;  %s142_s1 = sshll.u32 %s216_s0, 4  ;;  %s143_s1 = int_to_ptr.vmem [resolvable:$true] %s142_s1 }
   0x7   :  { %s192_s2 = scalar_lea.vmem %s143_s1, 256  ;;  %p197_p1 = scmp.lt.s32.totalorder %s143_s1, %s143_s1 }
   0x8   :  { %p193_p0 = scmp.ne.s32.totalorder %s143_s1, %s192_s2  ;;  %p198_p2 = scmp.lt.s32.totalorder %s192_s2, %s192_s2 }
   0x9   :  { %180 = vmatpush3.bf16.msra.mxu0 %v177_v6 }
   0xa   :  { %p199_p3 = por %p198_p2, %p197_p1 }
   0xc   :  { %171 = vmatmul.mubr.msk.f32.vlgmr.msra.gmra.mrb[0].mxu0 %vm28_vm0, %v16_v7  ;;  %p200_p4 = pnand %p199_p3, %p193_p0 }
  0xdf   :  { %v172_v9 = vpop.f32.mrb[0].mxu0 }
  0xe0   :  { %v101_v10 = vpop.f32.mrb[1].mxu0  ;;  %v107_v12 = vadd.f32 %v172_v9, %v153_v8 }
  0xe1   :  { %v102_v11 = vadd.f32 %v153_v8, %v101_v10 }
  0xe2   :  { %v114_v14 = vsel %vm110_vm1, %v107_v12, -inf }
  0xe3   :  { %v111_v13 = vsel %vm110_vm1, %v102_v11, -inf }
  0xe4   :  { %112 = vmax.xlane.f32.xlu0 %v111_v13 }
  0xe8   :  { %115 = vmax.xlane.f32.xlu0 %v114_v14 }
 0x171   :  { %v113_v15 = vpop.xlane.xlu0 %112 }
 0x172   :  { %v117_v16 = vsub.f32 %v102_v11, %v113_v15 }
 0x174   :  { %v119_v17 = vmul.f32 1.442695, %v117_v16 }
 0x175   :  { %v116_v18 = vpop.xlane.xlu0 %115 }
 0x176   :  { %184 = vpow2.f32 %v119_v17  ;;  %v118_v19 = vsub.f32 %v107_v12, %v116_v18 }
 0x178   :  { %v121_v20 = vmul.f32 1.442695, %v118_v19 }
 0x17a   :  { %186 = vpow2.f32 %v121_v20 }
 0x180   :  { %v185_v21 = vpop.eup %184 }
 0x181   :  { %v123_v22 = vsel %vm110_vm1, %v185_v21, 0.0 }
 0x182   :  { %124 = vadd.xlane.f32.xlu1 %v123_v22 }
 0x184   :  { %v187_v23 = vpop.eup %186 }
 0x185   :  { %v126_v24 = vsel %vm110_vm1, %v187_v23, 0.0 }
 0x186   :  { %127 = vadd.xlane.f32.xlu1 %v126_v24 }
 0x20f   :  { %v125_v25 = vpop.xlane.xlu1 %124 }
 0x210   :  { %188 = vlog2.f32 %v125_v25 }
 0x213   :  { %v128_v26 = vpop.xlane.xlu1 %127 }
 0x214   :  { %190 = vlog2.f32 %v128_v26 }
 0x21a   :  { %v189_v27 = vpop.eup %188 }
 0x21b   :  { %v130_v28 = vmul.f32 0.6931472, %v189_v27 }
 0x21d   :  { %v133_v29 = vsub.f32 %v117_v16, %v130_v28 }
 0x21e   :  { %v191_v30 = vpop.eup %190 }
 0x21f   :  { %135 = vst.msk [vmem:[#allocation2] sm:$0xff] %vm110_vm1, %v133_v29  ;;  %v132_v31 = vmul.f32 0.6931472, %v191_v30 }
 0x221   :  { %v134_v32 = vsub.f32 %v118_v19, %v132_v31 }
 0x223   :  { %136 = vst.msk [vmem:[#allocation2 + $0x8] sm:$0xff] %vm110_vm1, %v134_v32 }
 0x224   :  { %203 = shalt.err (!%p200_p4)
}
 0x225   :  { %s204_s28 = scalar_lea.hbm %s281_s3, 256 }
 0x226   :  { %p205_p5 = scmp.ne.s32.totalorder %s281_s3, %s204_s28  ;;  %p208_p6 = scmp.lt.u32.totalorder %s204_s28, %s281_s3 }
 0x228   :  { %p210_p7 = pnand %p208_p6, %p205_p5 }
 0x22a   :  { %213 = shalt.err (!%p210_p7)
}
 0x22b   :  { %s217_s6 = smov 128   ;;  %s218_s7 = smov 8  }
 0x22c   :  { %148 = dma.vmem_to_hbm [thread:$0]  %s143_s1, 256, %s281_s3, [#allocation3], %s217_s6, %s217_s6, %s218_s7  }
 0x22d   :  { %214 = dma.done.wait [#allocation3], 256  }
 0x22e   :  { %215 = vsyncadd [#allocation3], 4294967040 }
 0x22f   :  { %152 = vsyncpa [#allocation3], 1 }

</bundles_post_ra>
